<compile_context>
chip_gen: v6e
topology: v6e:2x2x1
jax: 0.10.0
libtpu: 0.0.40
codegen_flags: <defaults>
</compile_context>

<pallas_src>
import functools

import jax
import jax.numpy as jnp
from jax import lax
from jax.experimental import pallas as pl
from jax.experimental.pallas import tpu as pltpu
import numpy as np


def _round_up(n, m):
    return ((n + m - 1) // m) * m


def lstm_kernel(x_ref, wih_ref, whh_ref, b_ref, wout_ref, bout_ref,
                out_ref, gx_ref, h_ref, *, seq_len, batch):
    """Whole-sequence LSTM + ReLU + Linear, all resident in VMEM.

    x_ref   : (S*Bp, Ip)      flattened, zero-padded inputs
    wih_ref : (Ip, 4*Hp)      weight_ih_l0.T, gate-blocked & zero-padded
    whh_ref : (Hp, 4*Hp)      weight_hh_l0.T, gate-blocked & zero-padded
    b_ref   : (1, 4*Hp)       bias_ih_l0 + bias_hh_l0, zero-padded
    wout_ref: (Hp, Op)        layer2.weight.T, zero-padded
    bout_ref: (1, Op)         layer2.bias, zero-padded
    out_ref : (S*Bp, Op)
    gx_ref  : (S*Bp, 4*Hp)    VMEM scratch: per-timestep input projections
    h_ref   : (S*Bp, Hp)      VMEM scratch: per-timestep hidden states
    """
    S, B = seq_len, batch
    Hp = whh_ref.shape[0]

    # ---- Phase 1: batched input projection for ALL timesteps (one MXU op,
    #      off the serial critical path; bias folded in here once). ----------
    gx_ref[...] = (
        jnp.dot(x_ref[...], wih_ref[...], preferred_element_type=jnp.float32)
        + b_ref[...])

    # ---- Phase 2: serial recurrence, fully unrolled (static indices give the
    #      scheduler cross-step visibility; only h @ Whh per step). ----------
    h = jnp.zeros((B, Hp), jnp.float32)
    c = jnp.zeros((B, Hp), jnp.float32)
    for t in range(S):
        # Re-read Whh from VMEM each step (keeps vreg live ranges bounded).
        gates = gx_ref[pl.ds(t * B, B), :] + jnp.dot(
            h, whh_ref[...], preferred_element_type=jnp.float32)
        # Hp == 128, so every gate slice is a full, unmasked lane-aligned vreg.
        i_g = jax.nn.sigmoid(gates[:, 0 * Hp:1 * Hp])
        f_g = jax.nn.sigmoid(gates[:, 1 * Hp:2 * Hp])
        g_g = jnp.tanh(gates[:, 2 * Hp:3 * Hp])
        o_g = jax.nn.sigmoid(gates[:, 3 * Hp:4 * Hp])
        c = f_g * c + i_g * g_g
        h = o_g * jnp.tanh(c)
        h_ref[pl.ds(t * B, B), :] = h  # aligned (Bp multiple of 8) full-lane store

    # ---- Phase 3: ReLU + output Linear, batched over all timesteps; single
    #      lane-dense bulk store. --------------------------------------------
    h_all = jnp.maximum(h_ref[...], 0.0)
    out_ref[...] = (
        jnp.dot(h_all, wout_ref[...], preferred_element_type=jnp.float32)
        + bout_ref[...])


def lstm_forward(x, w_ih, w_hh, b_ih, b_hh, w_out, b_out):
    """Forward pass of the PyTorch LSTM module.

    x     : (S, B, I) float32
    w_ih  : (4H, I)   weight_ih_l0
    w_hh  : (4H, H)   weight_hh_l0
    b_ih  : (4H,)     bias_ih_l0
    b_hh  : (4H,)     bias_hh_l0
    w_out : (O, H)    layer2.weight
    b_out : (O,)      layer2.bias
    returns (S, B, O) float32
    """
    S, B, I = x.shape
    H = w_hh.shape[1]
    O = w_out.shape[0]

    LANE, SUB = 128, 8
    Ip = _round_up(I, LANE)
    Hp = _round_up(H, LANE)
    Op = _round_up(O, LANE)
    Bp = _round_up(B, SUB)

    # ---- Pad parameters to lane-dense layouts (zeros keep the math exact) ---
    w_ih_t = jnp.asarray(w_ih, jnp.float32).T          # (I, 4H)
    w_hh_t = jnp.asarray(w_hh, jnp.float32).T          # (H, 4H)
    b_gates = jnp.asarray(b_ih + b_hh, jnp.float32)    # (4H,)

    wih_p = jnp.zeros((Ip, 4 * Hp), jnp.float32)
    whh_p = jnp.zeros((Hp, 4 * Hp), jnp.float32)
    b_p = jnp.zeros((1, 4 * Hp), jnp.float32)
    for g in range(4):  # place each gate block at a 128-lane-aligned offset
        wih_p = wih_p.at[:I, g * Hp:g * Hp + H].set(w_ih_t[:, g * H:(g + 1) * H])
        whh_p = whh_p.at[:H, g * Hp:g * Hp + H].set(w_hh_t[:, g * H:(g + 1) * H])
        b_p = b_p.at[0, g * Hp:g * Hp + H].set(b_gates[g * H:(g + 1) * H])

    wout_p = jnp.zeros((Hp, Op), jnp.float32).at[:H, :O].set(
        jnp.asarray(w_out, jnp.float32).T)
    bout_p = jnp.zeros((1, Op), jnp.float32).at[0, :O].set(
        jnp.asarray(b_out, jnp.float32))

    x_p = jnp.zeros((S, Bp, Ip), jnp.float32).at[:, :B, :I].set(
        jnp.asarray(x, jnp.float32)).reshape(S * Bp, Ip)

    kernel = functools.partial(lstm_kernel, seq_len=S, batch=Bp)

    # TODO(synk): if S / H ever grow large, tile the sequence with a grid axis
    # (h/c carried in persistent scratch) and shard batch across v7x's two
    # TensorCores; at these toy sizes everything fits VMEM on one core.
    out2d = pl.pallas_call(
        kernel,
        out_shape=jax.ShapeDtypeStruct((S * Bp, Op), jnp.float32),
        grid_spec=pltpu.PrefetchScalarGridSpec(
            num_scalar_prefetch=0,
            grid=(1,),
            in_specs=[
                pl.BlockSpec((S * Bp, Ip), lambda i: (0, 0)),
                pl.BlockSpec((Ip, 4 * Hp), lambda i: (0, 0)),
                pl.BlockSpec((Hp, 4 * Hp), lambda i: (0, 0)),
                pl.BlockSpec((1, 4 * Hp), lambda i: (0, 0)),
                pl.BlockSpec((Hp, Op), lambda i: (0, 0)),
                pl.BlockSpec((1, Op), lambda i: (0, 0)),
            ],
            out_specs=pl.BlockSpec((S * Bp, Op), lambda i: (0, 0)),
            scratch_shapes=[
                pltpu.VMEM((S * Bp, 4 * Hp), jnp.float32),  # gx scratch
                pltpu.VMEM((S * Bp, Hp), jnp.float32),      # h history scratch
            ],
        ),
        compiler_params=pltpu.CompilerParams(
            dimension_semantics=("arbitrary",)),
    )(x_p, wih_p, whh_p, b_p, wout_p, bout_p)

    return out2d.reshape(S, Bp, Op)[:, :B, :O]


def reference_forward(x, w_ih, w_hh, b_ih, b_hh, w_out, b_out):
    """Pure-JAX reference (same math, unpadded) for the correctness check."""
    S, B, I = x.shape
    H = w_hh.shape[1]
    w_ih_t, w_hh_t = w_ih.T, w_hh.T
    b = b_ih + b_hh

    def step(carry, x_t):
        h, c = carry
        gates = x_t @ w_ih_t + h @ w_hh_t + b
        i_g = jax.nn.sigmoid(gates[:, :H])
        f_g = jax.nn.sigmoid(gates[:, H:2 * H])
        g_g = jnp.tanh(gates[:, 2 * H:3 * H])
        o_g = jax.nn.sigmoid(gates[:, 3 * H:])
        c = f_g * c + i_g * g_g
        h = o_g * jnp.tanh(c)
        y = jnp.maximum(h, 0.0) @ w_out.T + b_out
        return (h, c), y

    init = (jnp.zeros((B, H), jnp.float32), jnp.zeros((B, H), jnp.float32))
    _, ys = lax.scan(step, init, x)
    return ys


if __name__ == "__main__":
    # Module hyper-parameters (from __init__): input_size=2, hidden_size=4,
    # num_layer=1.  output_size chosen as 3 (default Nums=0 is degenerate).
    input_size, hidden_size, output_size = 2, 4, 3
    seq_len, batch = 8, 4

    key = jax.random.PRNGKey(0)
    ks = jax.random.split(key, 8)
    bound = 1.0 / np.sqrt(hidden_size)  # PyTorch-style uniform init

    def uni(k, shape):
        return jax.random.uniform(k, shape, jnp.float32, -bound, bound)

    # PyTorch parameter shapes.
    w_ih = uni(ks[0], (4 * hidden_size, input_size))   # weight_ih_l0
    w_hh = uni(ks[1], (4 * hidden_size, hidden_size))  # weight_hh_l0
    b_ih = uni(ks[2], (4 * hidden_size,))              # bias_ih_l0
    b_hh = uni(ks[3], (4 * hidden_size,))              # bias_hh_l0
    w_out = uni(ks[4], (output_size, hidden_size))     # layer2.weight
    b_out = uni(ks[5], (output_size,))                 # layer2.bias

    x = jax.random.normal(ks[6], (seq_len, batch, input_size), jnp.float32)

    out = lstm_forward(x, w_ih, w_hh, b_ih, b_hh, w_out, b_out)
    out = jax.block_until_ready(out)

    ref = jax.block_until_ready(
        reference_forward(x, w_ih, w_hh, b_ih, b_hh, w_out, b_out))

    assert out.shape == (seq_len, batch, output_size)
    np.testing.assert_allclose(np.asarray(out), np.asarray(ref),
                               rtol=1e-5, atol=1e-5)
    print("KERNEL_OK")
</pallas_src>

<mosaic_0001>
module attributes {stable_mosaic.version = 11 : i64} {
  func.func @lstm_kernel(%arg0: i32, %arg1: memref<64x128xf32, #tpu.memory_space<vmem>>, %arg2: memref<128x512xf32, #tpu.memory_space<vmem>>, %arg3: memref<128x512xf32, #tpu.memory_space<vmem>>, %arg4: memref<1x512xf32, #tpu.memory_space<vmem>>, %arg5: memref<128x128xf32, #tpu.memory_space<vmem>>, %arg6: memref<1x128xf32, #tpu.memory_space<vmem>>, %arg7: memref<64x128xf32, #tpu.memory_space<vmem>>, %arg8: memref<64x512xf32, #tpu.memory_space<vmem>>, %arg9: memref<64x128xf32, #tpu.memory_space<vmem>>) attributes {dimension_semantics = [#tpu.dimension_semantics<arbitrary>], iteration_bounds = array<i64: 1>, scalar_prefetch = 0 : i64, scratch_operands = 2 : i64, tpu.core_type = #tpu.core_type<tc>, window_params = [{pipeline_mode = #tpu.pipeline_mode<synchronous>, transform_indices = @transform_0, window_bounds = array<i64: 64, 128>}, {pipeline_mode = #tpu.pipeline_mode<synchronous>, transform_indices = @transform_1, window_bounds = array<i64: 128, 512>}, {pipeline_mode = #tpu.pipeline_mode<synchronous>, transform_indices = @transform_2, window_bounds = array<i64: 128, 512>}, {pipeline_mode = #tpu.pipeline_mode<synchronous>, transform_indices = @transform_3, window_bounds = array<i64: 1, 512>}, {pipeline_mode = #tpu.pipeline_mode<synchronous>, transform_indices = @transform_4, window_bounds = array<i64: 128, 128>}, {pipeline_mode = #tpu.pipeline_mode<synchronous>, transform_indices = @transform_5, window_bounds = array<i64: 1, 128>}, {pipeline_mode = #tpu.pipeline_mode<synchronous>, transform_indices = @transform_6, window_bounds = array<i64: 64, 128>}]} {
    %c0 = arith.constant 0 : index
    %c0_0 = arith.constant 0 : index
    %0 = vector.load %arg1[%c0, %c0_0] : memref<64x128xf32, #tpu.memory_space<vmem>>, vector<64x128xf32>
    %c0_1 = arith.constant 0 : index
    %c0_2 = arith.constant 0 : index
    %1 = vector.load %arg2[%c0_1, %c0_2] : memref<128x512xf32, #tpu.memory_space<vmem>>, vector<128x512xf32>
    %cst = arith.constant dense<0.000000e+00> : vector<64x512xf32>
    %2 = tpu.matmul %0, %1, %cst {dimension_numbers = #tpu.dot_dimension_numbers<[1], [0], [0], [1], [0, 0, 1, 1], [], []>} : vector<64x128xf32>, vector<128x512xf32>, vector<64x512xf32> -> vector<64x512xf32>
    %c0_3 = arith.constant 0 : index
    %c0_4 = arith.constant 0 : index
    %3 = vector.load %arg4[%c0_3, %c0_4] : memref<1x512xf32, #tpu.memory_space<vmem>>, vector<1x512xf32>
    %4 = vector.broadcast %3 : vector<1x512xf32> to vector<64x512xf32>
    %5 = arith.addf %2, %4 : vector<64x512xf32>
    %c0_5 = arith.constant 0 : index
    %c0_6 = arith.constant 0 : index
    %6 = vector.load %arg8[%c0_5, %c0_6] : memref<64x512xf32, #tpu.memory_space<vmem>>, vector<64x512xf32>
    tpu.vector_store %arg8[%c0_5, %c0_6], %5 {strides = array<i32>} : memref<64x512xf32, #tpu.memory_space<vmem>>, vector<64x512xf32>,
    %cst_7 = arith.constant 0.000000e+00 : f32
    %7 = vector.broadcast %cst_7 : f32 to vector<8x128xf32>
    %cst_8 = arith.constant 0.000000e+00 : f32
    %8 = vector.broadcast %cst_8 : f32 to vector<8x128xf32>
    %c0_9 = arith.constant 0 : index
    %c0_10 = arith.constant 0 : index
    %9 = vector.load %arg8[%c0_9, %c0_10] : memref<64x512xf32, #tpu.memory_space<vmem>>, vector<8x512xf32>
    %c0_11 = arith.constant 0 : index
    %c0_12 = arith.constant 0 : index
    %10 = vector.load %arg3[%c0_11, %c0_12] : memref<128x512xf32, #tpu.memory_space<vmem>>, vector<128x512xf32>
    %cst_13 = arith.constant dense<0.000000e+00> : vector<8x512xf32>
    %11 = tpu.matmul %7, %10, %cst_13 {dimension_numbers = #tpu.dot_dimension_numbers<[1], [0], [0], [1], [0, 0, 1, 1], [], []>} : vector<8x128xf32>, vector<128x512xf32>, vector<8x512xf32> -> vector<8x512xf32>
    %12 = arith.addf %9, %11 : vector<8x512xf32>
    %13 = vector.extract_strided_slice %12 {offsets = [0, 0], sizes = [8, 128], strides = [1, 1]} : vector<8x512xf32> to vector<8x128xf32>
    %14 = arith.negf %13 : vector<8x128xf32>
    %15 = math.exp %14 : vector<8x128xf32>
    %cst_14 = arith.constant 1.000000e+00 : f32
    %16 = vector.broadcast %cst_14 : f32 to vector<8x128xf32>
    %17 = arith.addf %16, %15 : vector<8x128xf32>
    %18 = arith.divf %16, %17 : vector<8x128xf32>
    %19 = vector.extract_strided_slice %12 {offsets = [0, 128], sizes = [8, 128], strides = [1, 1]} : vector<8x512xf32> to vector<8x128xf32>
    %20 = arith.negf %19 : vector<8x128xf32>
    %21 = math.exp %20 : vector<8x128xf32>
    %cst_15 = arith.constant 1.000000e+00 : f32
    %22 = vector.broadcast %cst_15 : f32 to vector<8x128xf32>
    %23 = arith.addf %22, %21 : vector<8x128xf32>
    %24 = arith.divf %22, %23 : vector<8x128xf32>
    %25 = vector.extract_strided_slice %12 {offsets = [0, 256], sizes = [8, 128], strides = [1, 1]} : vector<8x512xf32> to vector<8x128xf32>
    %26 = math.tanh %25 : vector<8x128xf32>
    %27 = vector.extract_strided_slice %12 {offsets = [0, 384], sizes = [8, 128], strides = [1, 1]} : vector<8x512xf32> to vector<8x128xf32>
    %28 = arith.negf %27 : vector<8x128xf32>
    %29 = math.exp %28 : vector<8x128xf32>
    %cst_16 = arith.constant 1.000000e+00 : f32
    %30 = vector.broadcast %cst_16 : f32 to vector<8x128xf32>
    %31 = arith.addf %30, %29 : vector<8x128xf32>
    %32 = arith.divf %30, %31 : vector<8x128xf32>
    %33 = arith.mulf %24, %8 : vector<8x128xf32>
    %34 = arith.mulf %18, %26 : vector<8x128xf32>
    %35 = arith.addf %33, %34 : vector<8x128xf32>
    %36 = math.tanh %35 : vector<8x128xf32>
    %37 = arith.mulf %32, %36 : vector<8x128xf32>
    %c0_17 = arith.constant 0 : index
    %c0_18 = arith.constant 0 : index
    %38 = vector.load %arg9[%c0_17, %c0_18] : memref<64x128xf32, #tpu.memory_space<vmem>>, vector<8x128xf32>
    tpu.vector_store %arg9[%c0_17, %c0_18], %37 {strides = array<i32>} : memref<64x128xf32, #tpu.memory_space<vmem>>, vector<8x128xf32>,
    %c8 = arith.constant 8 : index
    %c0_19 = arith.constant 0 : index
    %39 = vector.load %arg8[%c8, %c0_19] : memref<64x512xf32, #tpu.memory_space<vmem>>, vector<8x512xf32>
    %c0_20 = arith.constant 0 : index
    %c0_21 = arith.constant 0 : index
    %40 = vector.load %arg3[%c0_20, %c0_21] : memref<128x512xf32, #tpu.memory_space<vmem>>, vector<128x512xf32>
    %cst_22 = arith.constant dense<0.000000e+00> : vector<8x512xf32>
    %41 = tpu.matmul %37, %40, %cst_22 {dimension_numbers = #tpu.dot_dimension_numbers<[1], [0], [0], [1], [0, 0, 1, 1], [], []>} : vector<8x128xf32>, vector<128x512xf32>, vector<8x512xf32> -> vector<8x512xf32>
    %42 = arith.addf %39, %41 : vector<8x512xf32>
    %43 = vector.extract_strided_slice %42 {offsets = [0, 0], sizes = [8, 128], strides = [1, 1]} : vector<8x512xf32> to vector<8x128xf32>
    %44 = arith.negf %43 : vector<8x128xf32>
    %45 = math.exp %44 : vector<8x128xf32>
    %cst_23 = arith.constant 1.000000e+00 : f32
    %46 = vector.broadcast %cst_23 : f32 to vector<8x128xf32>
    %47 = arith.addf %46, %45 : vector<8x128xf32>
    %48 = arith.divf %46, %47 : vector<8x128xf32>
    %49 = vector.extract_strided_slice %42 {offsets = [0, 128], sizes = [8, 128], strides = [1, 1]} : vector<8x512xf32> to vector<8x128xf32>
    %50 = arith.negf %49 : vector<8x128xf32>
    %51 = math.exp %50 : vector<8x128xf32>
    %cst_24 = arith.constant 1.000000e+00 : f32
    %52 = vector.broadcast %cst_24 : f32 to vector<8x128xf32>
    %53 = arith.addf %52, %51 : vector<8x128xf32>
    %54 = arith.divf %52, %53 : vector<8x128xf32>
    %55 = vector.extract_strided_slice %42 {offsets = [0, 256], sizes = [8, 128], strides = [1, 1]} : vector<8x512xf32> to vector<8x128xf32>
    %56 = math.tanh %55 : vector<8x128xf32>
    %57 = vector.extract_strided_slice %42 {offsets = [0, 384], sizes = [8, 128], strides = [1, 1]} : vector<8x512xf32> to vector<8x128xf32>
    %58 = arith.negf %57 : vector<8x128xf32>
    %59 = math.exp %58 : vector<8x128xf32>
    %cst_25 = arith.constant 1.000000e+00 : f32
    %60 = vector.broadcast %cst_25 : f32 to vector<8x128xf32>
    %61 = arith.addf %60, %59 : vector<8x128xf32>
    %62 = arith.divf %60, %61 : vector<8x128xf32>
    %63 = arith.mulf %54, %35 : vector<8x128xf32>
    %64 = arith.mulf %48, %56 : vector<8x128xf32>
    %65 = arith.addf %63, %64 : vector<8x128xf32>
    %66 = math.tanh %65 : vector<8x128xf32>
    %67 = arith.mulf %62, %66 : vector<8x128xf32>
    %c8_26 = arith.constant 8 : index
    %c0_27 = arith.constant 0 : index
    %68 = vector.load %arg9[%c8_26, %c0_27] : memref<64x128xf32, #tpu.memory_space<vmem>>, vector<8x128xf32>
    tpu.vector_store %arg9[%c8_26, %c0_27], %67 {strides = array<i32>} : memref<64x128xf32, #tpu.memory_space<vmem>>, vector<8x128xf32>,
    %c16 = arith.constant 16 : index
    %c0_28 = arith.constant 0 : index
    %69 = vector.load %arg8[%c16, %c0_28] : memref<64x512xf32, #tpu.memory_space<vmem>>, vector<8x512xf32>
    %c0_29 = arith.constant 0 : index
    %c0_30 = arith.constant 0 : index
    %70 = vector.load %arg3[%c0_29, %c0_30] : memref<128x512xf32, #tpu.memory_space<vmem>>, vector<128x512xf32>
    %cst_31 = arith.constant dense<0.000000e+00> : vector<8x512xf32>
    %71 = tpu.matmul %67, %70, %cst_31 {dimension_numbers = #tpu.dot_dimension_numbers<[1], [0], [0], [1], [0, 0, 1, 1], [], []>} : vector<8x128xf32>, vector<128x512xf32>, vector<8x512xf32> -> vector<8x512xf32>
    %72 = arith.addf %69, %71 : vector<8x512xf32>
    %73 = vector.extract_strided_slice %72 {offsets = [0, 0], sizes = [8, 128], strides = [1, 1]} : vector<8x512xf32> to vector<8x128xf32>
    %74 = arith.negf %73 : vector<8x128xf32>
    %75 = math.exp %74 : vector<8x128xf32>
    %cst_32 = arith.constant 1.000000e+00 : f32
    %76 = vector.broadcast %cst_32 : f32 to vector<8x128xf32>
    %77 = arith.addf %76, %75 : vector<8x128xf32>
    %78 = arith.divf %76, %77 : vector<8x128xf32>
    %79 = vector.extract_strided_slice %72 {offsets = [0, 128], sizes = [8, 128], strides = [1, 1]} : vector<8x512xf32> to vector<8x128xf32>
    %80 = arith.negf %79 : vector<8x128xf32>
    %81 = math.exp %80 : vector<8x128xf32>
    %cst_33 = arith.constant 1.000000e+00 : f32
    %82 = vector.broadcast %cst_33 : f32 to vector<8x128xf32>
    %83 = arith.addf %82, %81 : vector<8x128xf32>
    %84 = arith.divf %82, %83 : vector<8x128xf32>
    %85 = vector.extract_strided_slice %72 {offsets = [0, 256], sizes = [8, 128], strides = [1, 1]} : vector<8x512xf32> to vector<8x128xf32>
    %86 = math.tanh %85 : vector<8x128xf32>
    %87 = vector.extract_strided_slice %72 {offsets = [0, 384], sizes = [8, 128], strides = [1, 1]} : vector<8x512xf32> to vector<8x128xf32>
    %88 = arith.negf %87 : vector<8x128xf32>
    %89 = math.exp %88 : vector<8x128xf32>
    %cst_34 = arith.constant 1.000000e+00 : f32
    %90 = vector.broadcast %cst_34 : f32 to vector<8x128xf32>
    %91 = arith.addf %90, %89 : vector<8x128xf32>
    %92 = arith.divf %90, %91 : vector<8x128xf32>
    %93 = arith.mulf %84, %65 : vector<8x128xf32>
    %94 = arith.mulf %78, %86 : vector<8x128xf32>
    %95 = arith.addf %93, %94 : vector<8x128xf32>
    %96 = math.tanh %95 : vector<8x128xf32>
    %97 = arith.mulf %92, %96 : vector<8x128xf32>
    %c16_35 = arith.constant 16 : index
    %c0_36 = arith.constant 0 : index
    %98 = vector.load %arg9[%c16_35, %c0_36] : memref<64x128xf32, #tpu.memory_space<vmem>>, vector<8x128xf32>
    tpu.vector_store %arg9[%c16_35, %c0_36], %97 {strides = array<i32>} : memref<64x128xf32, #tpu.memory_space<vmem>>, vector<8x128xf32>,
    %c24 = arith.constant 24 : index
    %c0_37 = arith.constant 0 : index
    %99 = vector.load %arg8[%c24, %c0_37] : memref<64x512xf32, #tpu.memory_space<vmem>>, vector<8x512xf32>
    %c0_38 = arith.constant 0 : index
    %c0_39 = arith.constant 0 : index
    %100 = vector.load %arg3[%c0_38, %c0_39] : memref<128x512xf32, #tpu.memory_space<vmem>>, vector<128x512xf32>
    %cst_40 = arith.constant dense<0.000000e+00> : vector<8x512xf32>
    %101 = tpu.matmul %97, %100, %cst_40 {dimension_numbers = #tpu.dot_dimension_numbers<[1], [0], [0], [1], [0, 0, 1, 1], [], []>} : vector<8x128xf32>, vector<128x512xf32>, vector<8x512xf32> -> vector<8x512xf32>
    %102 = arith.addf %99, %101 : vector<8x512xf32>
    %103 = vector.extract_strided_slice %102 {offsets = [0, 0], sizes = [8, 128], strides = [1, 1]} : vector<8x512xf32> to vector<8x128xf32>
    %104 = arith.negf %103 : vector<8x128xf32>
    %105 = math.exp %104 : vector<8x128xf32>
    %cst_41 = arith.constant 1.000000e+00 : f32
    %106 = vector.broadcast %cst_41 : f32 to vector<8x128xf32>
    %107 = arith.addf %106, %105 : vector<8x128xf32>
    %108 = arith.divf %106, %107 : vector<8x128xf32>
    %109 = vector.extract_strided_slice %102 {offsets = [0, 128], sizes = [8, 128], strides = [1, 1]} : vector<8x512xf32> to vector<8x128xf32>
    %110 = arith.negf %109 : vector<8x128xf32>
    %111 = math.exp %110 : vector<8x128xf32>
    %cst_42 = arith.constant 1.000000e+00 : f32
    %112 = vector.broadcast %cst_42 : f32 to vector<8x128xf32>
    %113 = arith.addf %112, %111 : vector<8x128xf32>
    %114 = arith.divf %112, %113 : vector<8x128xf32>
    %115 = vector.extract_strided_slice %102 {offsets = [0, 256], sizes = [8, 128], strides = [1, 1]} : vector<8x512xf32> to vector<8x128xf32>
    %116 = math.tanh %115 : vector<8x128xf32>
    %117 = vector.extract_strided_slice %102 {offsets = [0, 384], sizes = [8, 128], strides = [1, 1]} : vector<8x512xf32> to vector<8x128xf32>
    %118 = arith.negf %117 : vector<8x128xf32>
    %119 = math.exp %118 : vector<8x128xf32>
    %cst_43 = arith.constant 1.000000e+00 : f32
    %120 = vector.broadcast %cst_43 : f32 to vector<8x128xf32>
    %121 = arith.addf %120, %119 : vector<8x128xf32>
    %122 = arith.divf %120, %121 : vector<8x128xf32>
    %123 = arith.mulf %114, %95 : vector<8x128xf32>
    %124 = arith.mulf %108, %116 : vector<8x128xf32>
    %125 = arith.addf %123, %124 : vector<8x128xf32>
    %126 = math.tanh %125 : vector<8x128xf32>
    %127 = arith.mulf %122, %126 : vector<8x128xf32>
    %c24_44 = arith.constant 24 : index
    %c0_45 = arith.constant 0 : index
    %128 = vector.load %arg9[%c24_44, %c0_45] : memref<64x128xf32, #tpu.memory_space<vmem>>, vector<8x128xf32>
    tpu.vector_store %arg9[%c24_44, %c0_45], %127 {strides = array<i32>} : memref<64x128xf32, #tpu.memory_space<vmem>>, vector<8x128xf32>,
    %c32 = arith.constant 32 : index
    %c0_46 = arith.constant 0 : index
    %129 = vector.load %arg8[%c32, %c0_46] : memref<64x512xf32, #tpu.memory_space<vmem>>, vector<8x512xf32>
    %c0_47 = arith.constant 0 : index
    %c0_48 = arith.constant 0 : index
    %130 = vector.load %arg3[%c0_47, %c0_48] : memref<128x512xf32, #tpu.memory_space<vmem>>, vector<128x512xf32>
    %cst_49 = arith.constant dense<0.000000e+00> : vector<8x512xf32>
    %131 = tpu.matmul %127, %130, %cst_49 {dimension_numbers = #tpu.dot_dimension_numbers<[1], [0], [0], [1], [0, 0, 1, 1], [], []>} : vector<8x128xf32>, vector<128x512xf32>, vector<8x512xf32> -> vector<8x512xf32>
    %132 = arith.addf %129, %131 : vector<8x512xf32>
    %133 = vector.extract_strided_slice %132 {offsets = [0, 0], sizes = [8, 128], strides = [1, 1]} : vector<8x512xf32> to vector<8x128xf32>
    %134 = arith.negf %133 : vector<8x128xf32>
    %135 = math.exp %134 : vector<8x128xf32>
    %cst_50 = arith.constant 1.000000e+00 : f32
    %136 = vector.broadcast %cst_50 : f32 to vector<8x128xf32>
    %137 = arith.addf %136, %135 : vector<8x128xf32>
    %138 = arith.divf %136, %137 : vector<8x128xf32>
    %139 = vector.extract_strided_slice %132 {offsets = [0, 128], sizes = [8, 128], strides = [1, 1]} : vector<8x512xf32> to vector<8x128xf32>
    %140 = arith.negf %139 : vector<8x128xf32>
    %141 = math.exp %140 : vector<8x128xf32>
    %cst_51 = arith.constant 1.000000e+00 : f32
    %142 = vector.broadcast %cst_51 : f32 to vector<8x128xf32>
    %143 = arith.addf %142, %141 : vector<8x128xf32>
    %144 = arith.divf %142, %143 : vector<8x128xf32>
    %145 = vector.extract_strided_slice %132 {offsets = [0, 256], sizes = [8, 128], strides = [1, 1]} : vector<8x512xf32> to vector<8x128xf32>
    %146 = math.tanh %145 : vector<8x128xf32>
    %147 = vector.extract_strided_slice %132 {offsets = [0, 384], sizes = [8, 128], strides = [1, 1]} : vector<8x512xf32> to vector<8x128xf32>
    %148 = arith.negf %147 : vector<8x128xf32>
    %149 = math.exp %148 : vector<8x128xf32>
    %cst_52 = arith.constant 1.000000e+00 : f32
    %150 = vector.broadcast %cst_52 : f32 to vector<8x128xf32>
    %151 = arith.addf %150, %149 : vector<8x128xf32>
    %152 = arith.divf %150, %151 : vector<8x128xf32>
    %153 = arith.mulf %144, %125 : vector<8x128xf32>
    %154 = arith.mulf %138, %146 : vector<8x128xf32>
    %155 = arith.addf %153, %154 : vector<8x128xf32>
    %156 = math.tanh %155 : vector<8x128xf32>
    %157 = arith.mulf %152, %156 : vector<8x128xf32>
    %c32_53 = arith.constant 32 : index
    %c0_54 = arith.constant 0 : index
    %158 = vector.load %arg9[%c32_53, %c0_54] : memref<64x128xf32, #tpu.memory_space<vmem>>, vector<8x128xf32>
    tpu.vector_store %arg9[%c32_53, %c0_54], %157 {strides = array<i32>} : memref<64x128xf32, #tpu.memory_space<vmem>>, vector<8x128xf32>,
    %c40 = arith.constant 40 : index
    %c0_55 = arith.constant 0 : index
    %159 = vector.load %arg8[%c40, %c0_55] : memref<64x512xf32, #tpu.memory_space<vmem>>, vector<8x512xf32>
    %c0_56 = arith.constant 0 : index
    %c0_57 = arith.constant 0 : index
    %160 = vector.load %arg3[%c0_56, %c0_57] : memref<128x512xf32, #tpu.memory_space<vmem>>, vector<128x512xf32>
    %cst_58 = arith.constant dense<0.000000e+00> : vector<8x512xf32>
    %161 = tpu.matmul %157, %160, %cst_58 {dimension_numbers = #tpu.dot_dimension_numbers<[1], [0], [0], [1], [0, 0, 1, 1], [], []>} : vector<8x128xf32>, vector<128x512xf32>, vector<8x512xf32> -> vector<8x512xf32>
    %162 = arith.addf %159, %161 : vector<8x512xf32>
    %163 = vector.extract_strided_slice %162 {offsets = [0, 0], sizes = [8, 128], strides = [1, 1]} : vector<8x512xf32> to vector<8x128xf32>
    %164 = arith.negf %163 : vector<8x128xf32>
    %165 = math.exp %164 : vector<8x128xf32>
    %cst_59 = arith.constant 1.000000e+00 : f32
    %166 = vector.broadcast %cst_59 : f32 to vector<8x128xf32>
    %167 = arith.addf %166, %165 : vector<8x128xf32>
    %168 = arith.divf %166, %167 : vector<8x128xf32>
    %169 = vector.extract_strided_slice %162 {offsets = [0, 128], sizes = [8, 128], strides = [1, 1]} : vector<8x512xf32> to vector<8x128xf32>
    %170 = arith.negf %169 : vector<8x128xf32>
    %171 = math.exp %170 : vector<8x128xf32>
    %cst_60 = arith.constant 1.000000e+00 : f32
    %172 = vector.broadcast %cst_60 : f32 to vector<8x128xf32>
    %173 = arith.addf %172, %171 : vector<8x128xf32>
    %174 = arith.divf %172, %173 : vector<8x128xf32>
    %175 = vector.extract_strided_slice %162 {offsets = [0, 256], sizes = [8, 128], strides = [1, 1]} : vector<8x512xf32> to vector<8x128xf32>
    %176 = math.tanh %175 : vector<8x128xf32>
    %177 = vector.extract_strided_slice %162 {offsets = [0, 384], sizes = [8, 128], strides = [1, 1]} : vector<8x512xf32> to vector<8x128xf32>
    %178 = arith.negf %177 : vector<8x128xf32>
    %179 = math.exp %178 : vector<8x128xf32>
    %cst_61 = arith.constant 1.000000e+00 : f32
    %180 = vector.broadcast %cst_61 : f32 to vector<8x128xf32>
    %181 = arith.addf %180, %179 : vector<8x128xf32>
    %182 = arith.divf %180, %181 : vector<8x128xf32>
    %183 = arith.mulf %174, %155 : vector<8x128xf32>
    %184 = arith.mulf %168, %176 : vector<8x128xf32>
    %185 = arith.addf %183, %184 : vector<8x128xf32>
    %186 = math.tanh %185 : vector<8x128xf32>
    %187 = arith.mulf %182, %186 : vector<8x128xf32>
    %c40_62 = arith.constant 40 : index
    %c0_63 = arith.constant 0 : index
    %188 = vector.load %arg9[%c40_62, %c0_63] : memref<64x128xf32, #tpu.memory_space<vmem>>, vector<8x128xf32>
    tpu.vector_store %arg9[%c40_62, %c0_63], %187 {strides = array<i32>} : memref<64x128xf32, #tpu.memory_space<vmem>>, vector<8x128xf32>,
    %c48 = arith.constant 48 : index
    %c0_64 = arith.constant 0 : index
    %189 = vector.load %arg8[%c48, %c0_64] : memref<64x512xf32, #tpu.memory_space<vmem>>, vector<8x512xf32>
    %c0_65 = arith.constant 0 : index
    %c0_66 = arith.constant 0 : index
    %190 = vector.load %arg3[%c0_65, %c0_66] : memref<128x512xf32, #tpu.memory_space<vmem>>, vector<128x512xf32>
    %cst_67 = arith.constant dense<0.000000e+00> : vector<8x512xf32>
    %191 = tpu.matmul %187, %190, %cst_67 {dimension_numbers = #tpu.dot_dimension_numbers<[1], [0], [0], [1], [0, 0, 1, 1], [], []>} : vector<8x128xf32>, vector<128x512xf32>, vector<8x512xf32> -> vector<8x512xf32>
    %192 = arith.addf %189, %191 : vector<8x512xf32>
    %193 = vector.extract_strided_slice %192 {offsets = [0, 0], sizes = [8, 128], strides = [1, 1]} : vector<8x512xf32> to vector<8x128xf32>
    %194 = arith.negf %193 : vector<8x128xf32>
    %195 = math.exp %194 : vector<8x128xf32>
    %cst_68 = arith.constant 1.000000e+00 : f32
    %196 = vector.broadcast %cst_68 : f32 to vector<8x128xf32>
    %197 = arith.addf %196, %195 : vector<8x128xf32>
    %198 = arith.divf %196, %197 : vector<8x128xf32>
    %199 = vector.extract_strided_slice %192 {offsets = [0, 128], sizes = [8, 128], strides = [1, 1]} : vector<8x512xf32> to vector<8x128xf32>
    %200 = arith.negf %199 : vector<8x128xf32>
    %201 = math.exp %200 : vector<8x128xf32>
    %cst_69 = arith.constant 1.000000e+00 : f32
    %202 = vector.broadcast %cst_69 : f32 to vector<8x128xf32>
    %203 = arith.addf %202, %201 : vector<8x128xf32>
    %204 = arith.divf %202, %203 : vector<8x128xf32>
    %205 = vector.extract_strided_slice %192 {offsets = [0, 256], sizes = [8, 128], strides = [1, 1]} : vector<8x512xf32> to vector<8x128xf32>
    %206 = math.tanh %205 : vector<8x128xf32>
    %207 = vector.extract_strided_slice %192 {offsets = [0, 384], sizes = [8, 128], strides = [1, 1]} : vector<8x512xf32> to vector<8x128xf32>
    %208 = arith.negf %207 : vector<8x128xf32>
    %209 = math.exp %208 : vector<8x128xf32>
    %cst_70 = arith.constant 1.000000e+00 : f32
    %210 = vector.broadcast %cst_70 : f32 to vector<8x128xf32>
    %211 = arith.addf %210, %209 : vector<8x128xf32>
    %212 = arith.divf %210, %211 : vector<8x128xf32>
    %213 = arith.mulf %204, %185 : vector<8x128xf32>
    %214 = arith.mulf %198, %206 : vector<8x128xf32>
    %215 = arith.addf %213, %214 : vector<8x128xf32>
    %216 = math.tanh %215 : vector<8x128xf32>
    %217 = arith.mulf %212, %216 : vector<8x128xf32>
    %c48_71 = arith.constant 48 : index
    %c0_72 = arith.constant 0 : index
    %218 = vector.load %arg9[%c48_71, %c0_72] : memref<64x128xf32, #tpu.memory_space<vmem>>, vector<8x128xf32>
    tpu.vector_store %arg9[%c48_71, %c0_72], %217 {strides = array<i32>} : memref<64x128xf32, #tpu.memory_space<vmem>>, vector<8x128xf32>,
    %c56 = arith.constant 56 : index
    %c0_73 = arith.constant 0 : index
    %219 = vector.load %arg8[%c56, %c0_73] : memref<64x512xf32, #tpu.memory_space<vmem>>, vector<8x512xf32>
    %c0_74 = arith.constant 0 : index
    %c0_75 = arith.constant 0 : index
    %220 = vector.load %arg3[%c0_74, %c0_75] : memref<128x512xf32, #tpu.memory_space<vmem>>, vector<128x512xf32>
    %cst_76 = arith.constant dense<0.000000e+00> : vector<8x512xf32>
    %221 = tpu.matmul %217, %220, %cst_76 {dimension_numbers = #tpu.dot_dimension_numbers<[1], [0], [0], [1], [0, 0, 1, 1], [], []>} : vector<8x128xf32>, vector<128x512xf32>, vector<8x512xf32> -> vector<8x512xf32>
    %222 = arith.addf %219, %221 : vector<8x512xf32>
    %223 = vector.extract_strided_slice %222 {offsets = [0, 0], sizes = [8, 128], strides = [1, 1]} : vector<8x512xf32> to vector<8x128xf32>
    %224 = arith.negf %223 : vector<8x128xf32>
    %225 = math.exp %224 : vector<8x128xf32>
    %cst_77 = arith.constant 1.000000e+00 : f32
    %226 = vector.broadcast %cst_77 : f32 to vector<8x128xf32>
    %227 = arith.addf %226, %225 : vector<8x128xf32>
    %228 = arith.divf %226, %227 : vector<8x128xf32>
    %229 = vector.extract_strided_slice %222 {offsets = [0, 128], sizes = [8, 128], strides = [1, 1]} : vector<8x512xf32> to vector<8x128xf32>
    %230 = arith.negf %229 : vector<8x128xf32>
    %231 = math.exp %230 : vector<8x128xf32>
    %cst_78 = arith.constant 1.000000e+00 : f32
    %232 = vector.broadcast %cst_78 : f32 to vector<8x128xf32>
    %233 = arith.addf %232, %231 : vector<8x128xf32>
    %234 = arith.divf %232, %233 : vector<8x128xf32>
    %235 = vector.extract_strided_slice %222 {offsets = [0, 256], sizes = [8, 128], strides = [1, 1]} : vector<8x512xf32> to vector<8x128xf32>
    %236 = math.tanh %235 : vector<8x128xf32>
    %237 = vector.extract_strided_slice %222 {offsets = [0, 384], sizes = [8, 128], strides = [1, 1]} : vector<8x512xf32> to vector<8x128xf32>
    %238 = arith.negf %237 : vector<8x128xf32>
    %239 = math.exp %238 : vector<8x128xf32>
    %cst_79 = arith.constant 1.000000e+00 : f32
    %240 = vector.broadcast %cst_79 : f32 to vector<8x128xf32>
    %241 = arith.addf %240, %239 : vector<8x128xf32>
    %242 = arith.divf %240, %241 : vector<8x128xf32>
    %243 = arith.mulf %234, %215 : vector<8x128xf32>
    %244 = arith.mulf %228, %236 : vector<8x128xf32>
    %245 = arith.addf %243, %244 : vector<8x128xf32>
    %246 = math.tanh %245 : vector<8x128xf32>
    %247 = arith.mulf %242, %246 : vector<8x128xf32>
    %c56_80 = arith.constant 56 : index
    %c0_81 = arith.constant 0 : index
    %248 = vector.load %arg9[%c56_80, %c0_81] : memref<64x128xf32, #tpu.memory_space<vmem>>, vector<8x128xf32>
    tpu.vector_store %arg9[%c56_80, %c0_81], %247 {strides = array<i32>} : memref<64x128xf32, #tpu.memory_space<vmem>>, vector<8x128xf32>,
    %c0_82 = arith.constant 0 : index
    %c0_83 = arith.constant 0 : index
    %249 = vector.load %arg9[%c0_82, %c0_83] : memref<64x128xf32, #tpu.memory_space<vmem>>, vector<64x128xf32>
    %cst_84 = arith.constant 0.000000e+00 : f32
    %250 = vector.broadcast %cst_84 : f32 to vector<64x128xf32>
    %251 = arith.maximumf %249, %250 : vector<64x128xf32>
    %c0_85 = arith.constant 0 : index
    %c0_86 = arith.constant 0 : index
    %252 = vector.load %arg5[%c0_85, %c0_86] : memref<128x128xf32, #tpu.memory_space<vmem>>, vector<128x128xf32>
    %cst_87 = arith.constant dense<0.000000e+00> : vector<64x128xf32>
    %253 = tpu.matmul %251, %252, %cst_87 {dimension_numbers = #tpu.dot_dimension_numbers<[1], [0], [0], [1], [0, 0, 1, 1], [], []>} : vector<64x128xf32>, vector<128x128xf32>, vector<64x128xf32> -> vector<64x128xf32>
    %c0_88 = arith.constant 0 : index
    %c0_89 = arith.constant 0 : index
    %254 = vector.load %arg6[%c0_88, %c0_89] : memref<1x128xf32, #tpu.memory_space<vmem>>, vector<1x128xf32>
    %255 = vector.broadcast %254 : vector<1x128xf32> to vector<64x128xf32>
    %256 = arith.addf %253, %255 : vector<64x128xf32>
    %c0_90 = arith.constant 0 : index
    %c0_91 = arith.constant 0 : index
    %257 = vector.load %arg7[%c0_90, %c0_91] : memref<64x128xf32, #tpu.memory_space<vmem>>, vector<64x128xf32>
    tpu.vector_store %arg7[%c0_90, %c0_91], %256 {strides = array<i32>} : memref<64x128xf32, #tpu.memory_space<vmem>>, vector<64x128xf32>,
    return
  }
  func.func @transform_0(%arg0: i32) -> (i32, i32) {
    %c0_i32 = arith.constant 0 : i32
    %c0_i32_0 = arith.constant 0 : i32
    %c0_i32_1 = arith.constant 0 : i32
    return %c0_i32, %c0_i32_0 : i32, i32
  }
  func.func @transform_1(%arg0: i32) -> (i32, i32) {
    %c0_i32 = arith.constant 0 : i32
    %c0_i32_0 = arith.constant 0 : i32
    %c0_i32_1 = arith.constant 0 : i32
    return %c0_i32, %c0_i32_0 : i32, i32
  }
  func.func @transform_2(%arg0: i32) -> (i32, i32) {
    %c0_i32 = arith.constant 0 : i32
    %c0_i32_0 = arith.constant 0 : i32
    %c0_i32_1 = arith.constant 0 : i32
    return %c0_i32, %c0_i32_0 : i32, i32
  }
  func.func @transform_3(%arg0: i32) -> (i32, i32) {
    %c0_i32 = arith.constant 0 : i32
    %c0_i32_0 = arith.constant 0 : i32
    %c0_i32_1 = arith.constant 0 : i32
    return %c0_i32, %c0_i32_0 : i32, i32
  }
  func.func @transform_4(%arg0: i32) -> (i32, i32) {
    %c0_i32 = arith.constant 0 : i32
    %c0_i32_0 = arith.constant 0 : i32
    %c0_i32_1 = arith.constant 0 : i32
    return %c0_i32, %c0_i32_0 : i32, i32
  }
  func.func @transform_5(%arg0: i32) -> (i32, i32) {
    %c0_i32 = arith.constant 0 : i32
    %c0_i32_0 = arith.constant 0 : i32
    %c0_i32_1 = arith.constant 0 : i32
    return %c0_i32, %c0_i32_0 : i32, i32
  }
  func.func @transform_6(%arg0: i32) -> (i32, i32) {
    %c0_i32 = arith.constant 0 : i32
    %c0_i32_0 = arith.constant 0 : i32
    %c0_i32_1 = arith.constant 0 : i32
    return %c0_i32, %c0_i32_0 : i32, i32
  }
}

</mosaic_0001>

<bundles_post_ra>
// kernel: tpu_custom_call.1
= control target key start
LH: loop header
LB: loop body
LE: loop exit
PB: predicated region body
PF: predicated region fallthrough
CT: control target
= control target key end

     0   :  { %11 = vsyncpa [#allocation5], 0  ;;  %s3952_s0 = inlined_call_operand.hbm [shape: f32[64,128], index: 0, kind: input, shape index: {}]   ;;  %s3953_s1 = inlined_call_operand.hbm [shape: f32[128,512], index: 1, kind: input, shape index: {}]   ;;  %s3954_s2 = inlined_call_operand.hbm [shape: f32[128,512], index: 2, kind: input, shape index: {}]   ;;  %s3955_s3 = inlined_call_operand.vmem [shape: f32[1,512], index: 3, kind: input, shape index: {}]   ;;  %s3956_s4 = inlined_call_operand.hbm [shape: f32[128,128], index: 4, kind: input, shape index: {}]   ;;  %s3957_s5 = inlined_call_operand.vmem [shape: f32[1,128], index: 5, kind: input, shape index: {}]   ;;  %s3958_s6 = inlined_call_operand.hbm [shape: f32[64,128], index: 6, kind: output, shape index: {}]  }
   0x1   :  { %12 = vsyncpa [#allocation8], 0 }
   0x2   :  { %13 = vsyncpa [#allocation11], 0 }
   0x3   :  { %14 = vsyncpa [#allocation6], 0  ;;  %s2853_s21 = smov [#allocation7]  }
   0x4   :  { %s32_s22 = sshll.u32 %s2853_s21, 4  ;;  %s33_s22 = int_to_ptr.vmem [resolvable:$true] %s32_s22 }
   0x5   :  { %s2753_s23 = scalar_lea.vmem %s33_s22, 8192  ;;  %p2758_p1 = scmp.lt.s32.totalorder %s33_s22, %s33_s22 }
   0x6   :  { %p2754_p0 = scmp.ne.s32.totalorder %s33_s22, %s2753_s23  ;;  %p2759_p2 = scmp.lt.s32.totalorder %s2753_s23, %s2753_s23 }
   0x8   :  { %p2760_p3 = por %p2759_p2, %p2758_p1 }
   0xa   :  { %p2761_p4 = pnand %p2760_p3, %p2754_p0 }
   0xc   :  { %2764 = shalt.err (!%p2761_p4)
}
   0xd   :  { %s2854_s24 = smov 512   ;;  %s2855_s25 = smov 32  }
   0xe   :  { %38 = dma.hbm_to_vmem [thread:$0]  %s3953_s1, 8192, %s33_s22, [#allocation8], %s2854_s24, %s2854_s24, %s2855_s25  }
   0xf   :  { %s2856_s28 = smov [#allocation4]  }
  0x10   :  { %s20_s29 = sshll.u32 %s2856_s28, 4  ;;  %s21_s29 = int_to_ptr.vmem [resolvable:$true] %s20_s29 }
  0x11   :  { %s2773_s30 = scalar_lea.vmem %s21_s29, 1024  ;;  %p2778_p6 = scmp.lt.s32.totalorder %s21_s29, %s21_s29 }
  0x12   :  { %p2774_p5 = scmp.ne.s32.totalorder %s21_s29, %s2773_s30  ;;  %p2779_p7 = scmp.lt.s32.totalorder %s2773_s30, %s2773_s30 }
  0x14   :  { %p2780_p8 = por %p2779_p7, %p2778_p6 }
  0x16   :  { %p2781_p9 = pnand %p2780_p8, %p2774_p5 }
  0x18   :  { %2784 = shalt.err (!%p2781_p9)
}
  0x19   :  { %s2857_s7 = smov 128   ;;  %s2858_s8 = smov 8  }
  0x1a   :  { %26 = dma.hbm_to_vmem [thread:$0]  %s3952_s0, 1024, %s21_s29, [#allocation5], %s2857_s7, %s2857_s7, %s2858_s8  }
  0x1b   :  { %s2859_s1 = smov [#allocation9]   ;;  %s2860_s12 = smov [#allocation10]  }
  0x1c   :  { %s44_s11 = sshll.u32 %s2859_s1, 4  ;;  %s58_s13 = sshll.u32 %s2860_s12, 4  ;;  %s45_s11 = int_to_ptr.vmem [resolvable:$true] %s44_s11  ;;  %s59_s13 = int_to_ptr.vmem [resolvable:$true] %s58_s13 }
  0x1d   :  { %s2793_s14 = scalar_lea.vmem %s45_s11, 8192  ;;  %p2798_p11 = scmp.lt.s32.totalorder %s45_s11, %s45_s11 }
  0x1e   :  { %p2794_p10 = scmp.ne.s32.totalorder %s45_s11, %s2793_s14  ;;  %p2799_p12 = scmp.lt.s32.totalorder %s2793_s14, %s2793_s14 }
  0x20   :  { %p2800_p13 = por %p2799_p12, %p2798_p11 }
  0x22   :  { %p2801_p0 = pnand %p2800_p13, %p2794_p10 }
  0x24   :  { %2804 = shalt.err (!%p2801_p0)
}
  0x25   :  { %50 = dma.hbm_to_vmem [thread:$0]  %s3954_s2, 8192, %s45_s11, [#allocation8], %s2854_s24, %s2854_s24, %s2855_s25  }
  0x26   :  { %s2813_s0 = scalar_lea.vmem %s59_s13, 2048  ;;  %p2818_p2 = scmp.lt.s32.totalorder %s59_s13, %s59_s13 }
  0x27   :  { %p2814_p1 = scmp.ne.s32.totalorder %s59_s13, %s2813_s0  ;;  %p2819_p3 = scmp.lt.s32.totalorder %s2813_s0, %s2813_s0 }
  0x29   :  { %p2820_p4 = por %p2819_p3, %p2818_p2 }
  0x2b   :  { %p2821_p5 = pnand %p2820_p4, %p2814_p1 }
  0x2d   :  { %2824 = shalt.err (!%p2821_p5)
}
  0x2e   :  { %64 = dma.hbm_to_vmem [thread:$0]  %s3956_s4, 2048, %s59_s13, [#allocation11], %s2857_s7, %s2857_s7, %s2858_s8  }
  0x2f   :  { %2845 = dma.done.wait [#allocation5], 1024  }
  0x30   :  { %2846 = vsyncadd [#allocation5], 4294966272 }
  0x31   :  { %2847 = dma.done.wait [#allocation8], 16384  }
  0x32   :  { %2848 = vsyncadd [#allocation8], 4294950912 }
  0x33   :  { %2849 = dma.done.wait [#allocation11], 2048  }
  0x34   :  { %2850 = vsyncadd [#allocation11], 4294965248  ;;  %v3959_v0 = vmov 0.0   ;;  %v148_v1 = vld [vmem:[#allocation7 + $0x1e8] sm:$0xff]  ;;  %v147_v2 = vld [vmem:[#allocation7 + $0x1e0] sm:$0xff] }
  0x35   :  { %237 = vmatprep.mubr.f32.mxu1 %v3959_v0  ;;  %563 = vmatprep.mubr.f32.mxu0 %v3959_v0  ;;  %v144_v3 = vld [vmem:[#allocation7 + $0x1c8] sm:$0xff]  ;;  %v143_v5 = vld [vmem:[#allocation7 + $0x1c0] sm:$0xff] }
  0x36   :  { %173 = vmatprep.subr.mxu1 %v148_v1  ;;  %v2924_v4 = vld [vmem:[#allocation9 + $0x1e8] sm:$0xff]  ;;  %v2926_v6 = vld [vmem:[#allocation9 + $0x1e0] sm:$0xff] }
  0x37   :  { %174 = vmatpush1.msra.mxu1 %v147_v2  ;;  %499 = vmatprep.subr.mxu0 %v2924_v4  ;;  %v140_v7 = vld [vmem:[#allocation7 + $0x1a8] sm:$0xff]  ;;  %v139_v9 = vld [vmem:[#allocation7 + $0x1a0] sm:$0xff]  ;;  %v150_v2 = vld [vmem:[#allocation7 + $0x1f8] sm:$0xff] }
  0x38   :  { %v2929_v8 = vld [vmem:[#allocation9 + $0x1c8] sm:$0xff]  ;;  %175 = vmatprep.subr.mxu1 %v144_v3  ;;  %500 = vmatpush1.msra.mxu0 %v2926_v6  ;;  %v2932_v10 = vld [vmem:[#allocation9 + $0x1c0] sm:$0xff]  ;;  %v149_v3 = vld [vmem:[#allocation7 + $0x1f0] sm:$0xff] }
  0x39   :  { %v2934_v11 = vld [vmem:[#allocation9 + $0x1a8] sm:$0xff]  ;;  %176 = vmatpush1.msra.mxu1 %v143_v5  ;;  %501 = vmatprep.subr.mxu0 %v2929_v8  ;;  %v2937_v13 = vld [vmem:[#allocation9 + $0x1a0] sm:$0xff] }
  0x3a   :  { %v136_v12 = vld [vmem:[#allocation7 + $0x188] sm:$0xff]  ;;  %177 = vmatprep.subr.mxu1 %v140_v7  ;;  %502 = vmatpush1.msra.mxu0 %v2932_v10  ;;  %v135_v14 = vld [vmem:[#allocation7 + $0x180] sm:$0xff]  ;;  %v146_v7 = vld [vmem:[#allocation7 + $0x1d8] sm:$0xff] }
  0x3b   :  { %v2940_v15 = vld [vmem:[#allocation9 + $0x188] sm:$0xff]  ;;  %178 = vmatpush1.msra.mxu1 %v139_v9  ;;  %503 = vmatprep.subr.mxu0 %v2934_v11  ;;  %v2943_v17 = vld [vmem:[#allocation9 + $0x180] sm:$0xff]  ;;  %v145_v9 = vld [vmem:[#allocation7 + $0x1d0] sm:$0xff] }
  0x3c   :  { %v132_v16 = vld [vmem:[#allocation7 + $0x168] sm:$0xff]  ;;  %179 = vmatprep.subr.mxu1 %v136_v12  ;;  %504 = vmatpush1.msra.mxu0 %v2937_v13  ;;  %v131_v18 = vld [vmem:[#allocation7 + $0x160] sm:$0xff] }
  0x3d   :  { %v2946_v19 = vld [vmem:[#allocation9 + $0x168] sm:$0xff]  ;;  %180 = vmatpush1.msra.mxu1 %v135_v14  ;;  %505 = vmatprep.subr.mxu0 %v2940_v15  ;;  %v2949_v21 = vld [vmem:[#allocation9 + $0x160] sm:$0xff]  ;;  %v142_v14 = vld [vmem:[#allocation7 + $0x1b8] sm:$0xff] }
  0x3e   :  { %v128_v20 = vld [vmem:[#allocation7 + $0x148] sm:$0xff]  ;;  %181 = vmatprep.subr.mxu1 %v132_v16  ;;  %506 = vmatpush1.msra.mxu0 %v2943_v17  ;;  %v127_v22 = vld [vmem:[#allocation7 + $0x140] sm:$0xff]  ;;  %v141_v16 = vld [vmem:[#allocation7 + $0x1b0] sm:$0xff] }
  0x3f   :  { %v2952_v23 = vld [vmem:[#allocation9 + $0x148] sm:$0xff]  ;;  %182 = vmatpush1.msra.mxu1 %v131_v18  ;;  %507 = vmatprep.subr.mxu0 %v2946_v19  ;;  %v2955_v25 = vld [vmem:[#allocation9 + $0x140] sm:$0xff]  ;;  %v138_v18 = vld [vmem:[#allocation7 + $0x198] sm:$0xff] }
  0x40   :  { %v124_v24 = vld [vmem:[#allocation7 + $0x128] sm:$0xff]  ;;  %183 = vmatprep.subr.mxu1 %v128_v20  ;;  %508 = vmatpush1.msra.mxu0 %v2949_v21  ;;  %v123_v26 = vld [vmem:[#allocation7 + $0x120] sm:$0xff]  ;;  %v137_v20 = vld [vmem:[#allocation7 + $0x190] sm:$0xff] }
  0x41   :  { %v2958_v27 = vld [vmem:[#allocation9 + $0x128] sm:$0xff]  ;;  %184 = vmatpush1.msra.mxu1 %v127_v22  ;;  %509 = vmatprep.subr.mxu0 %v2952_v23  ;;  %v2961_v29 = vld [vmem:[#allocation9 + $0x120] sm:$0xff]  ;;  %v3029_v22 = vld [vmem:[#allocation4 + $0x10] sm:$0xff] }
  0x42   :  { %v120_v28 = vld [vmem:[#allocation7 + $0x108] sm:$0xff]  ;;  %185 = vmatprep.subr.mxu1 %v124_v24  ;;  %510 = vmatpush1.msra.mxu0 %v2955_v25  ;;  %v119_v30 = vld [vmem:[#allocation7 + $0x100] sm:$0xff]  ;;  %v134_v24 = vld [vmem:[#allocation7 + $0x178] sm:$0xff] }
  0x43   :  { %v2964_v31 = vld [vmem:[#allocation9 + $0x108] sm:$0xff]  ;;  %186 = vmatpush1.msra.mxu1 %v123_v26  ;;  %511 = vmatprep.subr.mxu0 %v2958_v27  ;;  %v2967_v33 = vld [vmem:[#allocation9 + $0x100] sm:$0xff]  ;;  %v133_v26 = vld [vmem:[#allocation7 + $0x170] sm:$0xff] }
  0x44   :  { %v116_v32 = vld [vmem:[#allocation7 + $0xe8] sm:$0xff]  ;;  %187 = vmatprep.subr.mxu1 %v120_v28  ;;  %512 = vmatpush1.msra.mxu0 %v2961_v29  ;;  %v115_v34 = vld [vmem:[#allocation7 + $0xe0] sm:$0xff]  ;;  %v130_v28 = vld [vmem:[#allocation7 + $0x158] sm:$0xff] }
  0x45   :  { %v2970_v35 = vld [vmem:[#allocation9 + $0xe8] sm:$0xff]  ;;  %188 = vmatpush1.msra.mxu1 %v119_v30  ;;  %513 = vmatprep.subr.mxu0 %v2964_v31  ;;  %v2973_v37 = vld [vmem:[#allocation9 + $0xe0] sm:$0xff]  ;;  %v129_v30 = vld [vmem:[#allocation7 + $0x150] sm:$0xff] }
  0x46   :  { %v112_v36 = vld [vmem:[#allocation7 + $0xc8] sm:$0xff]  ;;  %189 = vmatprep.subr.mxu1 %v116_v32  ;;  %514 = vmatpush1.msra.mxu0 %v2967_v33  ;;  %v111_v38 = vld [vmem:[#allocation7 + $0xc0] sm:$0xff]  ;;  %v3035_v32 = vld [vmem:[#allocation4 + $0x18] sm:$0xff] }
  0x47   :  { %v2976_v39 = vld [vmem:[#allocation9 + $0xc8] sm:$0xff]  ;;  %190 = vmatpush1.msra.mxu1 %v115_v34  ;;  %515 = vmatprep.subr.mxu0 %v2970_v35  ;;  %v2979_v41 = vld [vmem:[#allocation9 + $0xc0] sm:$0xff]  ;;  %v126_v34 = vld [vmem:[#allocation7 + $0x138] sm:$0xff] }
  0x48   :  { %v108_v40 = vld [vmem:[#allocation7 + $0xa8] sm:$0xff]  ;;  %191 = vmatprep.subr.mxu1 %v112_v36  ;;  %516 = vmatpush1.msra.mxu0 %v2973_v37  ;;  %v107_v42 = vld [vmem:[#allocation7 + $0xa0] sm:$0xff]  ;;  %v125_v36 = vld [vmem:[#allocation7 + $0x130] sm:$0xff] }
  0x49   :  { %v2982_v43 = vld [vmem:[#allocation9 + $0xa8] sm:$0xff]  ;;  %192 = vmatpush1.msra.mxu1 %v111_v38  ;;  %517 = vmatprep.subr.mxu0 %v2976_v39  ;;  %v2985_v45 = vld [vmem:[#allocation9 + $0xa0] sm:$0xff] }
  0x4a   :  { %v104_v44 = vld [vmem:[#allocation7 + $0x88] sm:$0xff]  ;;  %193 = vmatprep.subr.mxu1 %v108_v40  ;;  %518 = vmatpush1.msra.mxu0 %v2979_v41  ;;  %v103_v46 = vld [vmem:[#allocation7 + $0x80] sm:$0xff]  ;;  %v118_v40 = vld [vmem:[#allocation7 + $0xf8] sm:$0xff] }
  0x4b   :  { %v2988_v47 = vld [vmem:[#allocation9 + $0x88] sm:$0xff]  ;;  %194 = vmatpush1.msra.mxu1 %v107_v42  ;;  %519 = vmatprep.subr.mxu0 %v2982_v43  ;;  %v2991_v49 = vld [vmem:[#allocation9 + $0x80] sm:$0xff]  ;;  %v117_v42 = vld [vmem:[#allocation7 + $0xf0] sm:$0xff] }
  0x4c   :  { %v100_v48 = vld [vmem:[#allocation7 + $0x68] sm:$0xff]  ;;  %195 = vmatprep.subr.mxu1 %v104_v44  ;;  %520 = vmatpush1.msra.mxu0 %v2985_v45  ;;  %v99_v50 = vld [vmem:[#allocation7 + $0x60] sm:$0xff] }
  0x4d   :  { %v2994_v51 = vld [vmem:[#allocation9 + $0x68] sm:$0xff]  ;;  %196 = vmatpush1.msra.mxu1 %v103_v46  ;;  %521 = vmatprep.subr.mxu0 %v2988_v47  ;;  %v2997_v53 = vld [vmem:[#allocation9 + $0x60] sm:$0xff]  ;;  %v110_v46 = vld [vmem:[#allocation7 + $0xb8] sm:$0xff] }
  0x4e   :  { %v96_v52 = vld [vmem:[#allocation7 + $0x48] sm:$0xff]  ;;  %197 = vmatprep.subr.mxu1 %v100_v48  ;;  %522 = vmatpush1.msra.mxu0 %v2991_v49  ;;  %v95_v54 = vld [vmem:[#allocation7 + $0x40] sm:$0xff]  ;;  %v109_v48 = vld [vmem:[#allocation7 + $0xb0] sm:$0xff] }
  0x4f   :  { %v3000_v55 = vld [vmem:[#allocation9 + $0x48] sm:$0xff]  ;;  %198 = vmatpush1.msra.mxu1 %v99_v50  ;;  %523 = vmatprep.subr.mxu0 %v2994_v51  ;;  %v3003_v57 = vld [vmem:[#allocation9 + $0x40] sm:$0xff]  ;;  %v3053_v50 = vld [vmem:[#allocation4 + $0x30] sm:$0xff] }
  0x50   :  { %v92_v56 = vld [vmem:[#allocation7 + $0x28] sm:$0xff]  ;;  %199 = vmatprep.subr.mxu1 %v96_v52  ;;  %524 = vmatpush1.msra.mxu0 %v2997_v53  ;;  %v91_v58 = vld [vmem:[#allocation7 + $0x20] sm:$0xff]  ;;  %v102_v52 = vld [vmem:[#allocation7 + $0x78] sm:$0xff] }
  0x51   :  { %v3006_v59 = vld [vmem:[#allocation9 + $0x28] sm:$0xff]  ;;  %200 = vmatpush1.msra.mxu1 %v95_v54  ;;  %525 = vmatprep.subr.mxu0 %v3000_v55  ;;  %v3009_v61 = vld [vmem:[#allocation9 + $0x20] sm:$0xff]  ;;  %v101_v54 = vld [vmem:[#allocation7 + $0x70] sm:$0xff] }
  0x52   :  { %v88_v60 = vld [vmem:[#allocation7 + $0x8] sm:$0xff]  ;;  %201 = vmatprep.subr.mxu1 %v92_v56  ;;  %526 = vmatpush1.msra.mxu0 %v3003_v57  ;;  %v87_v62 = vld [vmem:[#allocation7] sm:$0xff]  ;;  %v3059_v56 = vld [vmem:[#allocation4 + $0x38] sm:$0xff] }
  0x53   :  { %v3012_v63 = vld [vmem:[#allocation9 + $0x8] sm:$0xff]  ;;  %202 = vmatpush1.msra.mxu1 %v91_v58  ;;  %527 = vmatprep.subr.mxu0 %v3006_v59  ;;  %v3015_v1 = vld [vmem:[#allocation4] sm:$0xff]  ;;  %v94_v58 = vld [vmem:[#allocation7 + $0x38] sm:$0xff] }
  0x54   :  { %203 = vmatprep.subr.mxu1 %v88_v60  ;;  %528 = vmatpush1.msra.mxu0 %v3009_v61  ;;  %v3018_v5 = vld [vmem:[#allocation9] sm:$0xff]  ;;  %v3023_v12 = vld [vmem:[#allocation4 + $0x8] sm:$0xff]  ;;  %v93_v60 = vld [vmem:[#allocation7 + $0x30] sm:$0xff] }
  0x55   :  { %204 = vmatpush1.msra.mxu1 %v87_v62  ;;  %529 = vmatprep.subr.mxu0 %v3012_v63  ;;  %v3041_v38 = vld [vmem:[#allocation4 + $0x20] sm:$0xff]  ;;  %v3047_v44 = vld [vmem:[#allocation4 + $0x28] sm:$0xff]  ;;  %v3065_v62 = vld [vmem:[#allocation9 + $0x1f8] sm:$0xff] }
  0x56   :  { %238 = vmatmul.mubr.f32.vlgmr.msra.gmra.mxu1 %v3015_v1  ;;  %286 = vmatprep.subr.mxu1 %v150_v2  ;;  %v3067_v2 = vld [vmem:[#allocation9 + $0x1f0] sm:$0xff] }
  0x57   :  { %287 = vmatpush1.msra.mxu1 %v149_v3  ;;  %530 = vmatpush1.msra.mxu0 %v3018_v5  ;;  %v3079_v3 = vld [vmem:[#allocation9 + $0x1b8] sm:$0xff] }
  0x58   :  { %288 = vmatprep.subr.mxu1 %v146_v7  ;;  %564 = vmatmul.mubr.f32.vlgmr.msra.gmra.mxu0 %v3959_v0  ;;  %v3095_v7 = vld [vmem:[#allocation9 + $0x178] sm:$0xff] }
  0x59   :  { %243 = vmatprep.mubr.f32.mxu1 %v3959_v0  ;;  %289 = vmatpush1.msra.mxu1 %v145_v9  ;;  %v3107_v9 = vld [vmem:[#allocation9 + $0x150] sm:$0xff] }
  0x5a   :  { %244 = vmatmul.mubr.f32.gmra.mxu1 %v3023_v12  ;;  %290 = vmatprep.subr.mxu1 %v142_v14  ;;  %v3123_v14 = vld [vmem:[#allocation9 + $0x110] sm:$0xff] }
  0x5b   :  { %291 = vmatpush1.msra.mxu1 %v141_v16  ;;  %249 = vmatprep.mubr.f32.mxu1 %v3959_v0  ;;  %v3127_v16 = vld [vmem:[#allocation9 + $0xf8] sm:$0xff] }
  0x5c   :  { %292 = vmatprep.subr.mxu1 %v138_v18  ;;  %738 = vmatprep.subr.mxu0 %v2924_v4  ;;  %v122_v4 = vld [vmem:[#allocation7 + $0x118] sm:$0xff]  ;;  %v3139_v18 = vld [vmem:[#allocation9 + $0xd0] sm:$0xff] }
  0x5d   :  { %293 = vmatpush1.msra.mxu1 %v137_v20  ;;  %739 = vmatpush1.msra.mxu0 %v2926_v6  ;;  %v121_v6 = vld [vmem:[#allocation7 + $0x110] sm:$0xff]  ;;  %v3143_v20 = vld [vmem:[#allocation9 + $0xb8] sm:$0xff] }
  0x5e   :  { %250 = vmatmul.mubr.f32.gmra.mxu1 %v3029_v22  ;;  %294 = vmatprep.subr.mxu1 %v134_v24  ;;  %v3159_v24 = vld [vmem:[#allocation9 + $0x78] sm:$0xff] }
  0x5f   :  { %295 = vmatpush1.msra.mxu1 %v133_v26  ;;  %255 = vmatprep.mubr.f32.mxu1 %v3959_v0  ;;  %v3171_v26 = vld [vmem:[#allocation9 + $0x50] sm:$0xff] }
  0x60   :  { %296 = vmatprep.subr.mxu1 %v130_v28  ;;  %740 = vmatprep.subr.mxu0 %v2929_v8  ;;  %v114_v8 = vld [vmem:[#allocation7 + $0xd8] sm:$0xff] }
  0x61   :  { %297 = vmatpush1.msra.mxu1 %v129_v30  ;;  %741 = vmatpush1.msra.mxu0 %v2932_v10  ;;  %v113_v10 = vld [vmem:[#allocation7 + $0xd0] sm:$0xff]  ;;  %v3175_v28 = vld [vmem:[#allocation9 + $0x38] sm:$0xff] }
  0x62   :  { %256 = vmatmul.mubr.f32.gmra.mxu1 %v3035_v32  ;;  %298 = vmatprep.subr.mxu1 %v126_v34  ;;  %v3187_v30 = vld [vmem:[#allocation9 + $0x10] sm:$0xff] }
  0x63   :  { %299 = vmatpush1.msra.mxu1 %v125_v36  ;;  %261 = vmatprep.mubr.f32.mxu1 %v3959_v0 }
  0x64   :  { %300 = vmatprep.subr.mxu1 %v122_v4  ;;  %742 = vmatprep.subr.mxu0 %v2934_v11  ;;  %v106_v11 = vld [vmem:[#allocation7 + $0x98] sm:$0xff] }
  0x65   :  { %301 = vmatpush1.msra.mxu1 %v121_v6  ;;  %743 = vmatpush1.msra.mxu0 %v2937_v13  ;;  %v105_v13 = vld [vmem:[#allocation7 + $0x90] sm:$0xff] }
  0x66   :  { %262 = vmatmul.mubr.f32.gmra.mxu1 %v3041_v38  ;;  %302 = vmatprep.subr.mxu1 %v118_v40 }
  0x67   :  { %303 = vmatpush1.msra.mxu1 %v117_v42  ;;  %267 = vmatprep.mubr.f32.mxu1 %v3959_v0 }
  0x68   :  { %304 = vmatprep.subr.mxu1 %v114_v8  ;;  %744 = vmatprep.subr.mxu0 %v2940_v15  ;;  %v98_v15 = vld [vmem:[#allocation7 + $0x58] sm:$0xff] }
  0x69   :  { %305 = vmatpush1.msra.mxu1 %v113_v10  ;;  %745 = vmatpush1.msra.mxu0 %v2943_v17  ;;  %v97_v17 = vld [vmem:[#allocation7 + $0x50] sm:$0xff] }
  0x6a   :  { %268 = vmatmul.mubr.f32.gmra.mxu1 %v3047_v44  ;;  %306 = vmatprep.subr.mxu1 %v110_v46 }
  0x6b   :  { %307 = vmatpush1.msra.mxu1 %v109_v48  ;;  %273 = vmatprep.mubr.f32.mxu1 %v3959_v0 }
  0x6c   :  { %308 = vmatprep.subr.mxu1 %v106_v11  ;;  %746 = vmatprep.subr.mxu0 %v2946_v19  ;;  %v90_v19 = vld [vmem:[#allocation7 + $0x18] sm:$0xff] }
  0x6d   :  { %309 = vmatpush1.msra.mxu1 %v105_v13  ;;  %747 = vmatpush1.msra.mxu0 %v2949_v21  ;;  %v89_v21 = vld [vmem:[#allocation7 + $0x10] sm:$0xff] }
  0x6e   :  { %274 = vmatmul.mubr.f32.gmra.mxu1 %v3053_v50  ;;  %310 = vmatprep.subr.mxu1 %v102_v52 }
  0x6f   :  { %311 = vmatpush1.msra.mxu1 %v101_v54  ;;  %279 = vmatprep.mubr.f32.mxu1 %v3959_v0 }
  0x70   :  { %312 = vmatprep.subr.mxu1 %v98_v15  ;;  %748 = vmatprep.subr.mxu0 %v2952_v23  ;;  %v3070_v23 = vld [vmem:[#allocation9 + $0x1d8] sm:$0xff] }
  0x71   :  { %313 = vmatpush1.msra.mxu1 %v97_v17  ;;  %749 = vmatpush1.msra.mxu0 %v2955_v25  ;;  %v3075_v25 = vld [vmem:[#allocation9 + $0x1d0] sm:$0xff] }
  0x72   :  { %280 = vmatmul.mubr.f32.gmra.mxu1 %v3059_v56  ;;  %314 = vmatprep.subr.mxu1 %v94_v58 }
  0x73   :  { %315 = vmatpush1.msra.mxu1 %v93_v60  ;;  %350 = vmatprep.mubr.f32.mxu1 %v3959_v0 }
  0x74   :  { %316 = vmatprep.subr.mxu1 %v90_v19  ;;  %750 = vmatprep.subr.mxu0 %v2958_v27  ;;  %v3082_v27 = vld [vmem:[#allocation9 + $0x1b0] sm:$0xff] }
  0x75   :  { %317 = vmatpush1.msra.mxu1 %v89_v21  ;;  %751 = vmatpush1.msra.mxu0 %v2961_v29  ;;  %v3086_v29 = vld [vmem:[#allocation9 + $0x198] sm:$0xff] }
  0x76   :  { %351 = vmatmul.mubr.f32.vlgmr.msra.gmra.mxu1 %v3015_v1  ;;  %570 = vmatprep.subr.mxu1 %v3065_v62  ;;  %v3091_v1 = vld [vmem:[#allocation9 + $0x190] sm:$0xff] }
  0x77   :  { %571 = vmatpush1.msra.mxu1 %v3067_v2  ;;  %356 = vmatprep.mubr.f32.mxu1 %v3959_v0 }
  0x78   :  { %572 = vmatprep.subr.mxu1 %v3070_v23  ;;  %752 = vmatprep.subr.mxu0 %v2964_v31  ;;  %v3098_v31 = vld [vmem:[#allocation9 + $0x170] sm:$0xff] }
  0x79   :  { %573 = vmatpush1.msra.mxu1 %v3075_v25  ;;  %753 = vmatpush1.msra.mxu0 %v2967_v33  ;;  %v3102_v33 = vld [vmem:[#allocation9 + $0x158] sm:$0xff] }
  0x7a   :  { %357 = vmatmul.mubr.f32.gmra.mxu1 %v3023_v12  ;;  %574 = vmatprep.subr.mxu1 %v3079_v3  ;;  %v3111_v12 = vld [vmem:[#allocation9 + $0x138] sm:$0xff] }
  0x7b   :  { %575 = vmatpush1.msra.mxu1 %v3082_v27  ;;  %362 = vmatprep.mubr.f32.mxu1 %v3959_v0 }
  0x7c   :  { %576 = vmatprep.subr.mxu1 %v3086_v29  ;;  %754 = vmatprep.subr.mxu0 %v2970_v35  ;;  %v3114_v35 = vld [vmem:[#allocation9 + $0x130] sm:$0xff] }
  0x7d   :  { %577 = vmatpush1.msra.mxu1 %v3091_v1  ;;  %755 = vmatpush1.msra.mxu0 %v2973_v37  ;;  %v3118_v37 = vld [vmem:[#allocation9 + $0x118] sm:$0xff] }
  0x7e   :  { %363 = vmatmul.mubr.f32.gmra.mxu1 %v3029_v22  ;;  %578 = vmatprep.subr.mxu1 %v3095_v7  ;;  %v3155_v22 = vld [vmem:[#allocation9 + $0x90] sm:$0xff] }
  0x7f   :  { %579 = vmatpush1.msra.mxu1 %v3098_v31  ;;  %368 = vmatprep.mubr.f32.mxu1 %v3959_v0 }
  0x80   :  { %580 = vmatprep.subr.mxu1 %v3102_v33  ;;  %756 = vmatprep.subr.mxu0 %v2976_v39  ;;  %v3130_v39 = vld [vmem:[#allocation9 + $0xf0] sm:$0xff] }
  0x81   :  { %581 = vmatpush1.msra.mxu1 %v3107_v9  ;;  %757 = vmatpush1.msra.mxu0 %v2979_v41  ;;  %v3134_v41 = vld [vmem:[#allocation9 + $0xd8] sm:$0xff] }
  0x82   :  { %369 = vmatmul.mubr.f32.gmra.mxu1 %v3035_v32  ;;  %582 = vmatprep.subr.mxu1 %v3111_v12 }
  0x83   :  { %583 = vmatpush1.msra.mxu1 %v3114_v35  ;;  %374 = vmatprep.mubr.f32.mxu1 %v3959_v0 }
  0x84   :  { %584 = vmatprep.subr.mxu1 %v3118_v37  ;;  %758 = vmatprep.subr.mxu0 %v2982_v43  ;;  %v3146_v43 = vld [vmem:[#allocation9 + $0xb0] sm:$0xff] }
  0x85   :  { %585 = vmatpush1.msra.mxu1 %v3123_v14  ;;  %759 = vmatpush1.msra.mxu0 %v2985_v45  ;;  %v3150_v45 = vld [vmem:[#allocation9 + $0x98] sm:$0xff] }
  0x86   :  { %375 = vmatmul.mubr.f32.gmra.mxu1 %v3041_v38  ;;  %586 = vmatprep.subr.mxu1 %v3127_v16 }
  0x87   :  { %587 = vmatpush1.msra.mxu1 %v3130_v39  ;;  %380 = vmatprep.mubr.f32.mxu1 %v3959_v0 }
  0x88   :  { %588 = vmatprep.subr.mxu1 %v3134_v41  ;;  %760 = vmatprep.subr.mxu0 %v2988_v47  ;;  %v3162_v47 = vld [vmem:[#allocation9 + $0x70] sm:$0xff] }
  0x89   :  { %589 = vmatpush1.msra.mxu1 %v3139_v18  ;;  %761 = vmatpush1.msra.mxu0 %v2991_v49  ;;  %v3166_v49 = vld [vmem:[#allocation9 + $0x58] sm:$0xff] }
  0x8a   :  { %381 = vmatmul.mubr.f32.gmra.mxu1 %v3047_v44  ;;  %590 = vmatprep.subr.mxu1 %v3143_v20 }
  0x8b   :  { %591 = vmatpush1.msra.mxu1 %v3146_v43  ;;  %386 = vmatprep.mubr.f32.mxu1 %v3959_v0 }
  0x8c   :  { %592 = vmatprep.subr.mxu1 %v3150_v45  ;;  %762 = vmatprep.subr.mxu0 %v2994_v51  ;;  %v3178_v51 = vld [vmem:[#allocation9 + $0x30] sm:$0xff] }
  0x8d   :  { %593 = vmatpush1.msra.mxu1 %v3155_v22  ;;  %763 = vmatpush1.msra.mxu0 %v2997_v53  ;;  %v3182_v53 = vld [vmem:[#allocation9 + $0x18] sm:$0xff] }
  0x8e   :  { %387 = vmatmul.mubr.f32.gmra.mxu1 %v3053_v50  ;;  %594 = vmatprep.subr.mxu1 %v3159_v24 }
  0x8f   :  { %595 = vmatpush1.msra.mxu1 %v3162_v47  ;;  %392 = vmatprep.mubr.f32.mxu1 %v3959_v0 }
  0x90   :  { %596 = vmatprep.subr.mxu1 %v3166_v49  ;;  %764 = vmatprep.subr.mxu0 %v3000_v55  ;;  %v153_v55 = vlaneseq }
  0x91   :  { %597 = vmatpush1.msra.mxu1 %v3171_v26  ;;  %765 = vmatpush1.msra.mxu0 %v3003_v57 }
  0x92   :  { %393 = vmatmul.mubr.f32.gmra.mxu1 %v3059_v56  ;;  %598 = vmatprep.subr.mxu1 %v3175_v28  ;;  %v154_v57 = vshrl.u32 %v153_v55, 7 }
  0x93   :  { %599 = vmatpush1.msra.mxu1 %v3178_v51  ;;  %634 = vmatprep.mubr.f32.mxu1 %v3959_v0 }
  0x94   :  { %600 = vmatprep.subr.mxu1 %v3182_v53  ;;  %766 = vmatprep.subr.mxu0 %v3006_v59  ;;  %v155_v59 = vsub.s32 0, %v154_v57 }
  0x95   :  { %601 = vmatpush1.msra.mxu1 %v3187_v30  ;;  %767 = vmatpush1.msra.mxu0 %v3009_v61  ;;  %v151_v61 = vld [vmem:[%s3955_s3] sm:$0xf] }
  0x96   :  { %635 = vmatmul.mubr.f32.vlgmr.msra.gmra.mxu1 %v3959_v0  ;;  %809 = vmatprep.subr.mxu1 %v3065_v62  ;;  %v156_v34 = vrot.slane %v151_v61, %v155_v59 }
  0x97   :  { %810 = vmatpush1.msra.mxu1 %v3067_v2  ;;  %768 = vmatprep.subr.mxu0 %v3012_v63 }
  0x98   :  { %811 = vmatprep.subr.mxu1 %v3070_v23  ;;  %769 = vmatpush1.msra.mxu0 %v3018_v5  ;;  %v159_v5 = vsub.s32 1, %v154_v57 }
  0x99   :  { %812 = vmatpush1.msra.mxu1 %v3075_v25  ;;  %802 = vmatprep.mubr.f32.mxu0 %v3959_v0 }
  0x9a   :  { %813 = vmatprep.subr.mxu1 %v3079_v3  ;;  %873 = vmatprep.mubr.f32.mxu1 %v3959_v0  ;;  %v160_v4 = vrot.slane %v151_v61, %v159_v5 }
  0x9b   :  { %814 = vmatpush1.msra.mxu1 %v3082_v27 }
  0x9c   :  { %815 = vmatprep.subr.mxu1 %v3086_v29 }
  0x9d   :  { %816 = vmatpush1.msra.mxu1 %v3091_v1 }
  0x9e   :  { %817 = vmatprep.subr.mxu1 %v3095_v7 }
  0x9f   :  { %818 = vmatpush1.msra.mxu1 %v3098_v31 }
  0xa0   :  { %819 = vmatprep.subr.mxu1 %v3102_v33 }
  0xa1   :  { %820 = vmatpush1.msra.mxu1 %v3107_v9 }
  0xa2   :  { %821 = vmatprep.subr.mxu1 %v3111_v12 }
  0xa3   :  { %822 = vmatpush1.msra.mxu1 %v3114_v35 }
  0xa4   :  { %823 = vmatprep.subr.mxu1 %v3118_v37 }
  0xa5   :  { %824 = vmatpush1.msra.mxu1 %v3123_v14 }
  0xa6   :  { %825 = vmatprep.subr.mxu1 %v3127_v16 }
  0xa7   :  { %826 = vmatpush1.msra.mxu1 %v3130_v39 }
  0xa8   :  { %827 = vmatprep.subr.mxu1 %v3134_v41 }
  0xa9   :  { %828 = vmatpush1.msra.mxu1 %v3139_v18 }
  0xaa   :  { %829 = vmatprep.subr.mxu1 %v3143_v20 }
  0xab   :  { %830 = vmatpush1.msra.mxu1 %v3146_v43 }
  0xac   :  { %831 = vmatprep.subr.mxu1 %v3150_v45 }
  0xad   :  { %832 = vmatpush1.msra.mxu1 %v3155_v22 }
  0xae   :  { %833 = vmatprep.subr.mxu1 %v3159_v24 }
  0xaf   :  { %834 = vmatpush1.msra.mxu1 %v3162_v47 }
  0xb0   :  { %835 = vmatprep.subr.mxu1 %v3166_v49 }
  0xb1   :  { %836 = vmatpush1.msra.mxu1 %v3171_v26 }
  0xb2   :  { %837 = vmatprep.subr.mxu1 %v3175_v28 }
  0xb3   :  { %838 = vmatpush1.msra.mxu1 %v3178_v51 }
  0xb4   :  { %839 = vmatprep.subr.mxu1 %v3182_v53 }
  0xb5   :  { %840 = vmatpush1.msra.mxu1 %v3187_v30 }
  0xb6   :  { %1048 = vmatprep.subr.mxu1 %v3065_v62 }
 0x116   :  { %v239_v63 = vpop.f32.mrf.mxu1 }
 0x118   :  { %v241_v32 = vpop.f32.mrf.mxu1 }
 0x11a   :  { %v245_v36 = vpop.f32.mrf.mxu1 }
 0x11b   :  { %v3236_v6 = vadd.f32 %v245_v36, %v156_v34 }
 0x11c   :  { %v247_v38 = vpop.f32.mrf.mxu1 }
 0x11d   :  { %v3238_v40 = vadd.f32 %v247_v38, %v160_v4  ;;  %v565_v38 = vpop.f32.mrf.mxu0 }
 0x11e   :  { %v251_v42 = vpop.f32.mrf.mxu1 }
 0x11f   :  { %v3240_v8 = vadd.f32 %v251_v42, %v156_v34 }
 0x120   :  { %v253_v10 = vpop.f32.mrf.mxu1 }
 0x121   :  { %v3242_v44 = vadd.f32 %v253_v10, %v160_v4 }
 0x122   :  { %v257_v46 = vpop.f32.mrf.mxu1 }
 0x123   :  { %v3244_v48 = vadd.f32 %v257_v46, %v156_v34  ;;  %v163_v46 = vsub.s32 2, %v154_v57 }
 0x124   :  { %v259_v11 = vpop.f32.mrf.mxu1 }
 0x125   :  { %3995 = vst [vmem:[#allocation17_spill] sm:$0xff] %v3244_v48  ;;  %v3246_v13 = vadd.f32 %v259_v11, %v160_v4 }
 0x126   :  { %v263_v50 = vpop.f32.mrf.mxu1 }
 0x127   :  { %3996 = vst [vmem:[#allocation18_spill] sm:$0xff] %v3246_v13  ;;  %v3248_v52 = vadd.f32 %v263_v50, %v156_v34  ;;  %v242_v50 = vadd.f32 %v241_v32, %v160_v4 }
 0x128   :  { %v265_v54 = vpop.f32.mrf.mxu1 }
 0x129   :  { %3997 = vst [vmem:[#allocation19_spill] sm:$0xff] %v3248_v52  ;;  %v3250_v15 = vadd.f32 %v265_v54, %v160_v4  ;;  %v167_v54 = vsub.s32 3, %v154_v57 }
 0x12a   :  { %v269_v17 = vpop.f32.mrf.mxu1 }
 0x12b   :  { %3998 = vst [vmem:[#allocation20_spill] sm:$0xff] %v3250_v15  ;;  %v3252_v56 = vadd.f32 %v269_v17, %v156_v34  ;;  %v240_v17 = vadd.f32 %v239_v63, %v156_v34 }
 0x12c   :  { %v271_v58 = vpop.f32.mrf.mxu1 }
 0x12d   :  { %3999 = vst [vmem:[#allocation21_spill] sm:$0xff] %v3252_v56  ;;  %v3254_v60 = vadd.f32 %v271_v58, %v160_v4  ;;  %v567_v58 = vpop.f32.mrf.mxu0  ;;  %v168_v56 = vrot.slane %v151_v61, %v167_v54 }
 0x12e   :  { %v275_v19 = vpop.f32.mrf.mxu1 }
 0x12f   :  { %4000 = vst [vmem:[#allocation22_spill] sm:$0xff] %v3254_v60  ;;  %v3256_v21 = vadd.f32 %v275_v19, %v156_v34  ;;  %v164_v60 = vrot.slane %v151_v61, %v163_v46 }
 0x130   :  { %v277_v55 = vpop.f32.mrf.mxu1 }
 0x131   :  { %4001 = vst [vmem:[#allocation23_spill] sm:$0xff] %v3256_v21  ;;  %v3258_v59 = vadd.f32 %v277_v55, %v160_v4  ;;  %v642_v21 = vadd.f32 %v567_v58, %v242_v50 }
 0x132   :  { %v281_v5 = vpop.f32.mrf.mxu1 }
 0x133   :  { %4002 = vst [vmem:[#allocation24_spill] sm:$0xff] %v3258_v59  ;;  %v3260_v36 = vadd.f32 %v281_v5, %v156_v34  ;;  %v641_v59 = vadd.f32 %v565_v38, %v240_v17 }
 0x134   :  { %v283_v42 = vpop.f32.mrf.mxu1 }
 0x135   :  { %4003 = vst [vmem:[#allocation25_spill] sm:$0xff] %v3260_v36  ;;  %v3262_v10 = vadd.f32 %v283_v42, %v160_v4  ;;  %v2515_v42 = vmul.f32 -1.442695, %v642_v21  ;;  %v2514_v52 = vmul.f32 -1.442695, %v641_v59 }
 0x136   :  { %v352_v11 = vpop.f32.mrf.mxu1 }
 0x137   :  { %4004 = vst [vmem:[#allocation26_spill] sm:$0xff] %v3262_v10  ;;  %2617 = vpow2.f32 %v2515_v42 }
 0x138   :  { %v354_v0 = vpop.f32.mrf.mxu1  ;;  %2619 = vpow2.f32 %v2514_v52 }
 0x13a   :  { %v358_v19 = vpop.f32.mrf.mxu1 }
 0x13b   :  { %v3264_v55 = vadd.f32 %v358_v19, %v164_v60 }
 0x13c   :  { %v360_v5 = vpop.f32.mrf.mxu1 }
 0x13d   :  { %v3266_v36 = vadd.f32 %v360_v5, %v168_v56 }
 0x13e   :  { %v364_v15 = vpop.f32.mrf.mxu1 }
 0x13f   :  { %v3268_v10 = vadd.f32 %v364_v15, %v164_v60 }
 0x140   :  { %v366_v32 = vpop.f32.mrf.mxu1 }
 0x141   :  { %4005 = vst [vmem:[#allocation27_spill] sm:$0xff] %v3268_v10  ;;  %v3270_v57 = vadd.f32 %v366_v32, %v168_v56 }
 0x142   :  { %v370_v63 = vpop.f32.mrf.mxu1 }
 0x143   :  { %v3272_v34 = vadd.f32 %v370_v63, %v164_v60 }
 0x144   :  { %v372_v61 = vpop.f32.mrf.mxu1  ;;  %v2618_v5 = vpop.eup %2617 }
 0x145   :  { %4006 = vst [vmem:[#allocation28_spill] sm:$0xff] %v3272_v34  ;;  %v3274_v4 = vadd.f32 %v372_v61, %v168_v56  ;;  %v2620_v42 = vpop.eup %2619  ;;  %v654_v61 = vadd.f32 1.0, %v2618_v5 }
 0x146   :  { %v376_v38 = vpop.f32.mrf.mxu1 }
 0x147   :  { %4007 = vst [vmem:[#allocation29_spill] sm:$0xff] %v3274_v4  ;;  %v3276_v46 = vadd.f32 %v376_v38, %v164_v60  ;;  %2621 = vrcp.f32 %v654_v61  ;;  %v3415_v61 = vld [vmem:[#allocation9 + $0x28] sm:$0xff] }
 0x148   :  { %v378_v50 = vpop.f32.mrf.mxu1  ;;  %4022 = vst [vmem:[#allocation43_spill] sm:$0xff] %v3415_v61 }
 0x149   :  { %4008 = vst [vmem:[#allocation30_spill] sm:$0xff] %v3276_v46  ;;  %v3278_v54 = vadd.f32 %v378_v50, %v168_v56  ;;  %v648_v50 = vadd.f32 1.0, %v2620_v42 }
 0x14a   :  { %v382_v15 = vpop.f32.mrf.mxu1 }
 0x14b   :  { %4009 = vst [vmem:[#allocation31_spill] sm:$0xff] %v3278_v54  ;;  %v3280_v21 = vadd.f32 %v382_v15, %v164_v60  ;;  %v353_v54 = vadd.f32 %v352_v11, %v164_v60  ;;  %2623 = vrcp.f32 %v648_v50  ;;  %v3421_v50 = vld [vmem:[#allocation9 + $0x8] sm:$0xff] }
 0x14c   :  { %v384_v59 = vpop.f32.mrf.mxu1  ;;  %4024 = vst [vmem:[#allocation45_spill] sm:$0xff] %v3421_v50 }
 0x14d   :  { %4010 = vst [vmem:[#allocation32_spill] sm:$0xff] %v3280_v21  ;;  %v3282_v17 = vadd.f32 %v384_v59, %v168_v56  ;;  %v355_v59 = vadd.f32 %v354_v0, %v168_v56 }
 0x14e   :  { %v388_v58 = vpop.f32.mrf.mxu1 }
 0x14f   :  { %4011 = vst [vmem:[#allocation33_spill] sm:$0xff] %v3282_v17  ;;  %v3284_v19 = vadd.f32 %v388_v58, %v164_v60 }
 0x150   :  { %v390_v52 = vpop.f32.mrf.mxu1 }
 0x151   :  { %4012 = vst [vmem:[#allocation34_spill] sm:$0xff] %v3284_v19  ;;  %v3286_v32 = vadd.f32 %v390_v52, %v168_v56 }
 0x152   :  { %v394_v63 = vpop.f32.mrf.mxu1 }
 0x153   :  { %4013 = vst [vmem:[#allocation35_spill] sm:$0xff] %v3286_v32  ;;  %v3288_v38 = vadd.f32 %v394_v63, %v164_v60 }
 0x154   :  { %v396_v46 = vpop.f32.mrf.mxu1  ;;  %v2622_v52 = vpop.eup %2621 }
 0x155   :  { %4014 = vst [vmem:[#allocation36_spill] sm:$0xff] %v3288_v38  ;;  %v3290_v15 = vadd.f32 %v396_v46, %v168_v56  ;;  %v664_v63 = vmul.f32 0.0, %v2622_v52 }
 0x156   :  { %v636_v21 = vpop.f32.mrf.mxu1 }
 0x157   :  { %4015 = vst [vmem:[#allocation37_spill] sm:$0xff] %v3290_v15  ;;  %v643_v17 = vadd.f32 %v636_v21, %v353_v54  ;;  %v3400_v54 = vld [vmem:[#allocation9 + $0x80] sm:$0xff]  ;;  %v3403_v21 = vld [vmem:[#allocation9 + $0x68] sm:$0xff] }
 0x158   :  { %v638_v58 = vpop.f32.mrf.mxu1  ;;  %v2624_v32 = vpop.eup %2623  ;;  %4018 = vst [vmem:[#allocation39_spill] sm:$0xff] %v3403_v21 }
 0x159   :  { %2625 = vtanh.f32 %v643_v17  ;;  %v644_v19 = vadd.f32 %v638_v58, %v355_v59  ;;  %v3406_v17 = vld [vmem:[#allocation9 + $0x60] sm:$0xff] }
 0x15a   :  { %4019 = vst [vmem:[#allocation40_spill] sm:$0xff] %v3406_v17  ;;  %v3424_v59 = vld [vmem:[#allocation9] sm:$0xff] }
 0x15b   :  { %v2516_v34 = vmul.f32 -1.442695, %v644_v19  ;;  %v3409_v19 = vld [vmem:[#allocation9 + $0x48] sm:$0xff]  ;;  %4025 = vst [vmem:[#allocation46_spill] sm:$0xff] %v3424_v59 }
 0x15c   :  { %4020 = vst [vmem:[#allocation41_spill] sm:$0xff] %v3409_v19 }
 0x15d   :  { %2627 = vpow2.f32 %v2516_v34  ;;  %v4017_v34 = vmov 0.0  }
 0x166   :  { %v2626_v5 = vpop.eup %2625 }
 0x167   :  { %v665_v38 = vmul.f32 %v2626_v5, %v2624_v32  ;;  %v3412_v32 = vld [vmem:[#allocation9 + $0x40] sm:$0xff] }
 0x168   :  { %4021 = vst [vmem:[#allocation42_spill] sm:$0xff] %v3412_v32 }
 0x169   :  { %v3292_v42 = vadd.f32 %v665_v38, %v664_v63  ;;  %v3418_v38 = vld [vmem:[#allocation9 + $0x20] sm:$0xff] }
 0x16a   :  { %v2628_v60 = vpop.eup %2627  ;;  %4023 = vst [vmem:[#allocation44_spill] sm:$0xff] %v3418_v38 }
 0x16b   :  { %v661_v11 = vadd.f32 1.0, %v2628_v60  ;;  %2629 = vtanh.f32 %v3292_v42 }
 0x16d   :  { %2631 = vrcp.f32 %v661_v11 }
 0x178   :  { %v2630_v0 = vpop.eup %2629 }
 0x17a   :  { %v2632_v56 = vpop.eup %2631 }
 0x17b   :  { %v3295_v46 = vmul.f32 %v2632_v56, %v2630_v0 }
 0x17d   :  { %4016 = vst [vmem:[#allocation38_spill] sm:$0xff] %v3295_v46  ;;  %803 = vmatmul.mubr.f32.vlgmr.msra.gmra.mxu0 %v3295_v46  ;;  %874 = vmatmul.mubr.f32.vlgmr.msra.gmra.mxu1 %v3295_v46 }
 0x17e   :  { %1049 = vmatpush1.msra.mxu1 %v3067_v2  ;;  %1041 = vmatprep.mubr.f32.mxu0 %v4017_v34 }
 0x17f   :  { %1050 = vmatprep.subr.mxu1 %v3070_v23  ;;  %1112 = vmatprep.mubr.f32.mxu1 %v4017_v34 }
 0x180   :  { %1051 = vmatpush1.msra.mxu1 %v3075_v25 }
 0x181   :  { %1052 = vmatprep.subr.mxu1 %v3079_v3 }
 0x182   :  { %1053 = vmatpush1.msra.mxu1 %v3082_v27 }
 0x183   :  { %1054 = vmatprep.subr.mxu1 %v3086_v29 }
 0x184   :  { %1055 = vmatpush1.msra.mxu1 %v3091_v1 }
 0x185   :  { %1056 = vmatprep.subr.mxu1 %v3095_v7 }
 0x186   :  { %1057 = vmatpush1.msra.mxu1 %v3098_v31 }
 0x187   :  { %1058 = vmatprep.subr.mxu1 %v3102_v33  ;;  %v3333_v33 = vld [vmem:[#allocation9 + $0x1e8] sm:$0xff] }
 0x188   :  { %1059 = vmatpush1.msra.mxu1 %v3107_v9  ;;  %977 = vmatprep.subr.mxu0 %v3333_v33  ;;  %v3336_v9 = vld [vmem:[#allocation9 + $0x1e0] sm:$0xff] }
 0x189   :  { %1060 = vmatprep.subr.mxu1 %v3111_v12  ;;  %978 = vmatpush1.msra.mxu0 %v3336_v9  ;;  %v3339_v12 = vld [vmem:[#allocation9 + $0x1c8] sm:$0xff] }
 0x18a   :  { %1061 = vmatpush1.msra.mxu1 %v3114_v35  ;;  %979 = vmatprep.subr.mxu0 %v3339_v12  ;;  %v3342_v35 = vld [vmem:[#allocation9 + $0x1c0] sm:$0xff] }
 0x18b   :  { %1062 = vmatprep.subr.mxu1 %v3118_v37  ;;  %980 = vmatpush1.msra.mxu0 %v3342_v35  ;;  %v3345_v37 = vld [vmem:[#allocation9 + $0x1a8] sm:$0xff] }
 0x18c   :  { %1063 = vmatpush1.msra.mxu1 %v3123_v14  ;;  %981 = vmatprep.subr.mxu0 %v3345_v37  ;;  %v3351_v14 = vld [vmem:[#allocation9 + $0x188] sm:$0xff] }
 0x18d   :  { %1064 = vmatprep.subr.mxu1 %v3127_v16  ;;  %v3354_v16 = vld [vmem:[#allocation9 + $0x180] sm:$0xff] }
 0x18e   :  { %1065 = vmatpush1.msra.mxu1 %v3130_v39  ;;  %v3357_v39 = vld [vmem:[#allocation9 + $0x168] sm:$0xff] }
 0x18f   :  { %1066 = vmatprep.subr.mxu1 %v3134_v41  ;;  %v3360_v41 = vld [vmem:[#allocation9 + $0x160] sm:$0xff] }
 0x190   :  { %1067 = vmatpush1.msra.mxu1 %v3139_v18  ;;  %v3363_v18 = vld [vmem:[#allocation9 + $0x148] sm:$0xff] }
 0x191   :  { %1068 = vmatprep.subr.mxu1 %v3143_v20  ;;  %v3366_v20 = vld [vmem:[#allocation9 + $0x140] sm:$0xff] }
 0x192   :  { %1069 = vmatpush1.msra.mxu1 %v3146_v43  ;;  %v3369_v43 = vld [vmem:[#allocation9 + $0x128] sm:$0xff] }
 0x193   :  { %1070 = vmatprep.subr.mxu1 %v3150_v45  ;;  %v3372_v45 = vld [vmem:[#allocation9 + $0x120] sm:$0xff] }
 0x194   :  { %1071 = vmatpush1.msra.mxu1 %v3155_v22  ;;  %v3375_v22 = vld [vmem:[#allocation9 + $0x108] sm:$0xff] }
 0x195   :  { %1072 = vmatprep.subr.mxu1 %v3159_v24  ;;  %v3377_v24 = vld [vmem:[#allocation9 + $0x100] sm:$0xff] }
 0x196   :  { %1073 = vmatpush1.msra.mxu1 %v3162_v47  ;;  %v3379_v47 = vld [vmem:[#allocation9 + $0xe8] sm:$0xff] }
 0x197   :  { %1074 = vmatprep.subr.mxu1 %v3166_v49  ;;  %v3382_v49 = vld [vmem:[#allocation9 + $0xe0] sm:$0xff] }
 0x198   :  { %1075 = vmatpush1.msra.mxu1 %v3171_v26  ;;  %v3385_v26 = vld [vmem:[#allocation9 + $0xc8] sm:$0xff] }
 0x199   :  { %1076 = vmatprep.subr.mxu1 %v3175_v28  ;;  %v3388_v28 = vld [vmem:[#allocation9 + $0xc0] sm:$0xff] }
 0x19a   :  { %1077 = vmatpush1.msra.mxu1 %v3178_v51  ;;  %v3391_v51 = vld [vmem:[#allocation9 + $0xa8] sm:$0xff] }
 0x19b   :  { %1078 = vmatprep.subr.mxu1 %v3182_v53  ;;  %v3394_v53 = vld [vmem:[#allocation9 + $0xa0] sm:$0xff] }
 0x19c   :  { %1079 = vmatpush1.msra.mxu1 %v3187_v30  ;;  %v3397_v30 = vld [vmem:[#allocation9 + $0x88] sm:$0xff] }
 0x19d   :  { %1287 = vmatprep.subr.mxu1 %v3065_v62  ;;  %v3348_v62 = vld [vmem:[#allocation9 + $0x1a0] sm:$0xff] }
 0x19e   :  { %982 = vmatpush1.msra.mxu0 %v3348_v62 }
 0x19f   :  { %983 = vmatprep.subr.mxu0 %v3351_v14 }
 0x1a0   :  { %984 = vmatpush1.msra.mxu0 %v3354_v16 }
 0x1a1   :  { %985 = vmatprep.subr.mxu0 %v3357_v39 }
 0x1a2   :  { %986 = vmatpush1.msra.mxu0 %v3360_v41 }
 0x1a3   :  { %987 = vmatprep.subr.mxu0 %v3363_v18 }
 0x1a4   :  { %988 = vmatpush1.msra.mxu0 %v3366_v20 }
 0x1a5   :  { %989 = vmatprep.subr.mxu0 %v3369_v43 }
 0x1a6   :  { %990 = vmatpush1.msra.mxu0 %v3372_v45 }
 0x1a7   :  { %991 = vmatprep.subr.mxu0 %v3375_v22 }
 0x1a8   :  { %992 = vmatpush1.msra.mxu0 %v3377_v24 }
 0x1a9   :  { %993 = vmatprep.subr.mxu0 %v3379_v47 }
 0x1aa   :  { %994 = vmatpush1.msra.mxu0 %v3382_v49 }
 0x1ab   :  { %995 = vmatprep.subr.mxu0 %v3385_v26 }
 0x1ac   :  { %996 = vmatpush1.msra.mxu0 %v3388_v28 }
 0x1ad   :  { %997 = vmatprep.subr.mxu0 %v3391_v51 }
 0x1ae   :  { %998 = vmatpush1.msra.mxu0 %v3394_v53 }
 0x1af   :  { %999 = vmatprep.subr.mxu0 %v3397_v30 }
 0x1b0   :  { %1000 = vmatpush1.msra.mxu0 %v3400_v54 }
 0x1b1   :  { %1001 = vmatprep.subr.mxu0 %v3403_v21 }
 0x1b2   :  { %1002 = vmatpush1.msra.mxu0 %v3406_v17 }
 0x1b3   :  { %1003 = vmatprep.subr.mxu0 %v3409_v19 }
 0x1b4   :  { %1004 = vmatpush1.msra.mxu0 %v3412_v32 }
 0x1b5   :  { %1005 = vmatprep.subr.mxu0 %v3415_v61 }
 0x1b6   :  { %1006 = vmatpush1.msra.mxu0 %v3418_v38 }
 0x1b7   :  { %1007 = vmatprep.subr.mxu0 %v3421_v50 }
 0x1b8   :  { %1008 = vmatpush1.msra.mxu0 %v3424_v59 }
 0x1b9   :  { %1216 = vmatprep.subr.mxu0 %v3333_v33 }
 0x23d   :  { %v804_v58 = vpop.f32.mrf.mxu0  ;;  %v875_v11 = vpop.f32.mrf.mxu1 }
 0x23e   :  { %v880_v52 = vadd.f32 %v804_v58, %v3236_v6  ;;  %v882_v46 = vadd.f32 %v875_v11, %v3264_v55  ;;  %v3525_v11 = vld [vmem:[#allocation9 + $0x78] sm:$0xff] }
 0x23f   :  { %v806_v5 = vpop.f32.mrf.mxu0  ;;  %v877_v56 = vpop.f32.mrf.mxu1  ;;  %4029 = vst [vmem:[#allocation50_spill] sm:$0xff] %v3525_v11 }
 0x240   :  { %v2517_v63 = vmul.f32 -1.442695, %v880_v52  ;;  %v881_v60 = vadd.f32 %v806_v5, %v3238_v40  ;;  %v883_v15 = vadd.f32 %v877_v56, %v3266_v36  ;;  %v3528_v56 = vld [vmem:[#allocation9 + $0x70] sm:$0xff] }
 0x241   :  { %4030 = vst [vmem:[#allocation51_spill] sm:$0xff] %v3528_v56 }
 0x242   :  { %2633 = vpow2.f32 %v2517_v63  ;;  %v2518_v0 = vmul.f32 -1.442695, %v881_v60  ;;  %v2519_v4 = vmul.f32 -1.442695, %v883_v15 }
 0x244   :  { %2635 = vpow2.f32 %v2518_v0 }
 0x245   :  { %2637 = vtanh.f32 %v882_v46  ;;  %v3522_v46 = vld [vmem:[#allocation9 + $0x90] sm:$0xff] }
 0x246   :  { %2639 = vpow2.f32 %v2519_v4  ;;  %v3516_v4 = vld [vmem:[#allocation9 + $0xb0] sm:$0xff]  ;;  %4028 = vst [vmem:[#allocation49_spill] sm:$0xff] %v3522_v46 }
 0x24f   :  { %v2634_v13 = vpop.eup %2633 }
 0x250   :  { %v887_v48 = vadd.f32 1.0, %v2634_v13 }
 0x251   :  { %v2636_v10 = vpop.eup %2635 }
 0x252   :  { %2641 = vrcp.f32 %v887_v48  ;;  %v893_v6 = vadd.f32 1.0, %v2636_v10  ;;  %v2638_v58 = vpop.eup %2637  ;;  %v3510_v48 = vld [vmem:[#allocation9 + $0xd0] sm:$0xff]  ;;  %v3513_v10 = vld [vmem:[#allocation9 + $0xb8] sm:$0xff] }
 0x253   :  { %v2640_v40 = vpop.eup %2639 }
 0x254   :  { %2643 = vrcp.f32 %v893_v6  ;;  %v900_v60 = vadd.f32 1.0, %v2640_v40  ;;  %v3531_v6 = vld [vmem:[#allocation9 + $0x58] sm:$0xff] }
 0x255   :  { %4031 = vst [vmem:[#allocation52_spill] sm:$0xff] %v3531_v6  ;;  %v3537_v40 = vld [vmem:[#allocation9 + $0x38] sm:$0xff] }
 0x256   :  { %2645 = vrcp.f32 %v900_v60  ;;  %4033 = vst [vmem:[#allocation54_spill] sm:$0xff] %v3537_v40 }
 0x25f   :  { %v2642_v52 = vpop.eup %2641 }
 0x260   :  { %v904_v5 = vmul.f32 %v2642_v52, %v2638_v58  ;;  %v3534_v58 = vld [vmem:[#allocation9 + $0x50] sm:$0xff] }
 0x261   :  { %v2644_v63 = vpop.eup %2643  ;;  %4032 = vst [vmem:[#allocation53_spill] sm:$0xff] %v3534_v58  ;;  %v3540_v52 = vld [vmem:[#allocation9 + $0x30] sm:$0xff] }
 0x262   :  { %v903_v0 = vmul.f32 %v2644_v63, %v3292_v42  ;;  %v3519_v42 = vld [vmem:[#allocation9 + $0x98] sm:$0xff]  ;;  %4034 = vst [vmem:[#allocation55_spill] sm:$0xff] %v3540_v52  ;;  %v3546_v63 = vld [vmem:[#allocation9 + $0x10] sm:$0xff] }
 0x263   :  { %v2646_v13 = vpop.eup %2645  ;;  %4027 = vst [vmem:[#allocation48_spill] sm:$0xff] %v3519_v42  ;;  %4036 = vst [vmem:[#allocation57_spill] sm:$0xff] %v3546_v63 }
 0x264   :  { %v3435_v36 = vadd.f32 %v904_v5, %v903_v0  ;;  %v3543_v5 = vld [vmem:[#allocation9 + $0x18] sm:$0xff] }
 0x265   :  { %4035 = vst [vmem:[#allocation56_spill] sm:$0xff] %v3543_v5 }
 0x266   :  { %2647 = vtanh.f32 %v3435_v36 }
 0x273   :  { %v2648_v55 = vpop.eup %2647 }
 0x274   :  { %v3438_v15 = vmul.f32 %v2648_v55, %v2646_v13 }
 0x276   :  { %4026 = vst [vmem:[#allocation47_spill] sm:$0xff] %v3438_v15  ;;  %1042 = vmatmul.mubr.f32.vlgmr.msra.gmra.mxu0 %v3438_v15  ;;  %1113 = vmatmul.mubr.f32.vlgmr.msra.gmra.mxu1 %v3438_v15 }
 0x277   :  { %1217 = vmatpush1.msra.mxu0 %v3336_v9  ;;  %1288 = vmatpush1.msra.mxu1 %v3067_v2  ;;  %v3485_v2 = vld [vmem:[#allocation9 + $0x158] sm:$0xff] }
 0x278   :  { %1218 = vmatprep.subr.mxu0 %v3339_v12  ;;  %1289 = vmatprep.subr.mxu1 %v3070_v23  ;;  %v3488_v23 = vld [vmem:[#allocation9 + $0x150] sm:$0xff] }
 0x279   :  { %1219 = vmatpush1.msra.mxu0 %v3342_v35  ;;  %1290 = vmatpush1.msra.mxu1 %v3075_v25  ;;  %v3491_v25 = vld [vmem:[#allocation9 + $0x138] sm:$0xff] }
 0x27a   :  { %1220 = vmatprep.subr.mxu0 %v3345_v37  ;;  %1291 = vmatprep.subr.mxu1 %v3079_v3  ;;  %v3494_v3 = vld [vmem:[#allocation9 + $0x130] sm:$0xff] }
 0x27b   :  { %1221 = vmatpush1.msra.mxu0 %v3348_v62  ;;  %1292 = vmatpush1.msra.mxu1 %v3082_v27  ;;  %v3497_v27 = vld [vmem:[#allocation9 + $0x118] sm:$0xff] }
 0x27c   :  { %1222 = vmatprep.subr.mxu0 %v3351_v14  ;;  %1293 = vmatprep.subr.mxu1 %v3086_v29  ;;  %v3499_v29 = vld [vmem:[#allocation9 + $0x110] sm:$0xff] }
 0x27d   :  { %1223 = vmatpush1.msra.mxu0 %v3354_v16  ;;  %1294 = vmatpush1.msra.mxu1 %v3091_v1  ;;  %v3501_v1 = vld [vmem:[#allocation9 + $0xf8] sm:$0xff] }
 0x27e   :  { %1224 = vmatprep.subr.mxu0 %v3357_v39  ;;  %1295 = vmatprep.subr.mxu1 %v3095_v7  ;;  %v3504_v7 = vld [vmem:[#allocation9 + $0xf0] sm:$0xff] }
 0x27f   :  { %1225 = vmatpush1.msra.mxu0 %v3360_v41  ;;  %1296 = vmatpush1.msra.mxu1 %v3098_v31  ;;  %v3507_v31 = vld [vmem:[#allocation9 + $0xd8] sm:$0xff] }
 0x280   :  { %1226 = vmatprep.subr.mxu0 %v3363_v18  ;;  %1280 = vmatprep.mubr.f32.mxu0 %v4017_v34 }
 0x281   :  { %1227 = vmatpush1.msra.mxu0 %v3366_v20  ;;  %1351 = vmatprep.mubr.f32.mxu1 %v4017_v34 }
 0x282   :  { %1228 = vmatprep.subr.mxu0 %v3369_v43  ;;  %1297 = vmatprep.subr.mxu1 %v3485_v2 }
 0x283   :  { %1229 = vmatpush1.msra.mxu0 %v3372_v45  ;;  %1298 = vmatpush1.msra.mxu1 %v3488_v23 }
 0x284   :  { %1230 = vmatprep.subr.mxu0 %v3375_v22  ;;  %1299 = vmatprep.subr.mxu1 %v3491_v25 }
 0x285   :  { %1231 = vmatpush1.msra.mxu0 %v3377_v24  ;;  %1300 = vmatpush1.msra.mxu1 %v3494_v3 }
 0x286   :  { %1232 = vmatprep.subr.mxu0 %v3379_v47  ;;  %1301 = vmatprep.subr.mxu1 %v3497_v27 }
 0x287   :  { %1233 = vmatpush1.msra.mxu0 %v3382_v49  ;;  %1302 = vmatpush1.msra.mxu1 %v3499_v29 }
 0x288   :  { %1234 = vmatprep.subr.mxu0 %v3385_v26  ;;  %1303 = vmatprep.subr.mxu1 %v3501_v1 }
 0x289   :  { %1235 = vmatpush1.msra.mxu0 %v3388_v28  ;;  %1304 = vmatpush1.msra.mxu1 %v3504_v7 }
 0x28a   :  { %1236 = vmatprep.subr.mxu0 %v3391_v51  ;;  %1305 = vmatprep.subr.mxu1 %v3507_v31 }
 0x28b   :  { %1237 = vmatpush1.msra.mxu0 %v3394_v53  ;;  %1306 = vmatpush1.msra.mxu1 %v3510_v48 }
 0x28c   :  { %1238 = vmatprep.subr.mxu0 %v3397_v30  ;;  %1307 = vmatprep.subr.mxu1 %v3513_v10 }
 0x28d   :  { %1239 = vmatpush1.msra.mxu0 %v3400_v54  ;;  %1308 = vmatpush1.msra.mxu1 %v3516_v4 }
 0x28e   :  { %1240 = vmatprep.subr.mxu0 %v3403_v21  ;;  %1309 = vmatprep.subr.mxu1 %v3519_v42 }
 0x28f   :  { %1241 = vmatpush1.msra.mxu0 %v3406_v17  ;;  %1310 = vmatpush1.msra.mxu1 %v3522_v46 }
 0x290   :  { %1242 = vmatprep.subr.mxu0 %v3409_v19  ;;  %1311 = vmatprep.subr.mxu1 %v3525_v11  ;;  %v4037_v11 = vld [vmem:[#allocation27_spill] sm:$0xff] }
 0x291   :  { %1243 = vmatpush1.msra.mxu0 %v3412_v32  ;;  %1312 = vmatpush1.msra.mxu1 %v3528_v56 }
 0x292   :  { %1244 = vmatprep.subr.mxu0 %v3415_v61  ;;  %1313 = vmatprep.subr.mxu1 %v3531_v6 }
 0x293   :  { %1245 = vmatpush1.msra.mxu0 %v3418_v38  ;;  %1314 = vmatpush1.msra.mxu1 %v3534_v58 }
 0x294   :  { %1246 = vmatprep.subr.mxu0 %v3421_v50  ;;  %1315 = vmatprep.subr.mxu1 %v3537_v40 }
 0x295   :  { %1247 = vmatpush1.msra.mxu0 %v3424_v59  ;;  %1316 = vmatpush1.msra.mxu1 %v3540_v52 }
 0x296   :  { %1455 = vmatprep.subr.mxu0 %v3333_v33  ;;  %1317 = vmatprep.subr.mxu1 %v3543_v5 }
 0x297   :  { %1318 = vmatpush1.msra.mxu1 %v3546_v63 }
 0x336   :  { %v1043_v60 = vpop.f32.mrf.mxu0  ;;  %v1114_v58 = vpop.f32.mrf.mxu1 }
 0x337   :  { %v1119_v0 = vadd.f32 %v1043_v60, %v3240_v8  ;;  %v1121_v52 = vadd.f32 %v1114_v58, %v4037_v11 }
 0x338   :  { %v1045_v13 = vpop.f32.mrf.mxu0  ;;  %v1116_v40 = vpop.f32.mrf.mxu1 }
 0x339   :  { %v2520_v55 = vmul.f32 -1.442695, %v1119_v0  ;;  %v1120_v15 = vadd.f32 %v1045_v13, %v3242_v44  ;;  %v1122_v56 = vadd.f32 %v1116_v40, %v3270_v57  ;;  %v3606_v40 = vld [vmem:[#allocation9 + $0x1d0] sm:$0xff] }
 0x33b   :  { %2649 = vpow2.f32 %v2520_v55  ;;  %v2521_v6 = vmul.f32 -1.442695, %v1120_v15  ;;  %v2522_v46 = vmul.f32 -1.442695, %v1122_v56 }
 0x33d   :  { %2651 = vpow2.f32 %v2521_v6 }
 0x33e   :  { %2653 = vtanh.f32 %v1121_v52  ;;  %v3609_v52 = vld [vmem:[#allocation9 + $0x1b8] sm:$0xff] }
 0x33f   :  { %2655 = vpow2.f32 %v2522_v46  ;;  %v3603_v46 = vld [vmem:[#allocation9 + $0x1d8] sm:$0xff] }
 0x348   :  { %v2650_v5 = vpop.eup %2649 }
 0x349   :  { %v1126_v42 = vadd.f32 1.0, %v2650_v5  ;;  %v3615_v5 = vld [vmem:[#allocation9 + $0x198] sm:$0xff] }
 0x34a   :  { %v2652_v63 = vpop.eup %2651 }
 0x34b   :  { %2657 = vrcp.f32 %v1126_v42  ;;  %v1132_v8 = vadd.f32 1.0, %v2652_v63  ;;  %v2654_v60 = vpop.eup %2653  ;;  %v3600_v42 = vld [vmem:[#allocation9 + $0x1f0] sm:$0xff] }
 0x34c   :  { %v2656_v44 = vpop.eup %2655  ;;  %v3618_v63 = vld [vmem:[#allocation9 + $0x190] sm:$0xff] }
 0x34d   :  { %2659 = vrcp.f32 %v1132_v8  ;;  %v1139_v6 = vadd.f32 1.0, %v2656_v44  ;;  %v3621_v8 = vld [vmem:[#allocation9 + $0x178] sm:$0xff] }
 0x34e   :  { %v4040_v44 = vld [vmem:[#allocation48_spill] sm:$0xff] }
 0x34f   :  { %2661 = vrcp.f32 %v1139_v6  ;;  %v4044_v6 = vld [vmem:[#allocation52_spill] sm:$0xff] }
 0x358   :  { %v2658_v0 = vpop.eup %2657 }
 0x359   :  { %v1143_v13 = vmul.f32 %v2658_v0, %v2654_v60  ;;  %v3624_v60 = vld [vmem:[#allocation9 + $0x170] sm:$0xff]  ;;  %v4041_v0 = vld [vmem:[#allocation49_spill] sm:$0xff] }
 0x35a   :  { %v2660_v15 = vpop.eup %2659 }
 0x35b   :  { %v1142_v55 = vmul.f32 %v2660_v15, %v3435_v36  ;;  %v3597_v36 = vld [vmem:[#allocation9 + $0x1f8] sm:$0xff]  ;;  %v4043_v15 = vld [vmem:[#allocation51_spill] sm:$0xff] }
 0x35c   :  { %v2662_v11 = vpop.eup %2661  ;;  %4039 = vst [vmem:[#allocation58_spill] sm:$0xff] %v3597_v36  ;;  %1526 = vmatprep.subr.mxu1 %v3597_v36 }
 0x35d   :  { %v3556_v57 = vadd.f32 %v1143_v13, %v1142_v55  ;;  %v4042_v13 = vld [vmem:[#allocation50_spill] sm:$0xff]  ;;  %v4045_v55 = vld [vmem:[#allocation53_spill] sm:$0xff] }
 0x35f   :  { %2663 = vtanh.f32 %v3556_v57 }
 0x36c   :  { %v2664_v56 = vpop.eup %2663 }
 0x36d   :  { %v3559_v58 = vmul.f32 %v2664_v56, %v2662_v11  ;;  %v4046_v11 = vld [vmem:[#allocation54_spill] sm:$0xff]  ;;  %v4047_v56 = vld [vmem:[#allocation55_spill] sm:$0xff] }
 0x36f   :  { %4038 = vst [vmem:[#allocation27_spill] sm:$0xff] %v3559_v58  ;;  %1281 = vmatmul.mubr.f32.vlgmr.msra.gmra.mxu0 %v3559_v58  ;;  %1352 = vmatmul.mubr.f32.vlgmr.msra.gmra.mxu1 %v3559_v58  ;;  %v4048_v58 = vld [vmem:[#allocation56_spill] sm:$0xff] }
 0x370   :  { %1456 = vmatpush1.msra.mxu0 %v3336_v9  ;;  %1519 = vmatprep.mubr.f32.mxu0 %v4017_v34 }
 0x371   :  { %1457 = vmatprep.subr.mxu0 %v3339_v12  ;;  %1590 = vmatprep.mubr.f32.mxu1 %v4017_v34  ;;  %v4049_v34 = vld [vmem:[#allocation57_spill] sm:$0xff] }
 0x372   :  { %1458 = vmatpush1.msra.mxu0 %v3342_v35  ;;  %1527 = vmatpush1.msra.mxu1 %v3600_v42 }
 0x373   :  { %1459 = vmatprep.subr.mxu0 %v3345_v37  ;;  %1528 = vmatprep.subr.mxu1 %v3603_v46 }
 0x374   :  { %1460 = vmatpush1.msra.mxu0 %v3348_v62  ;;  %1529 = vmatpush1.msra.mxu1 %v3606_v40 }
 0x375   :  { %1461 = vmatprep.subr.mxu0 %v3351_v14  ;;  %1530 = vmatprep.subr.mxu1 %v3609_v52 }
 0x376   :  { %1462 = vmatpush1.msra.mxu0 %v3354_v16 }
 0x377   :  { %1463 = vmatprep.subr.mxu0 %v3357_v39 }
 0x378   :  { %1464 = vmatpush1.msra.mxu0 %v3360_v41 }
 0x379   :  { %1465 = vmatprep.subr.mxu0 %v3363_v18 }
 0x37a   :  { %1466 = vmatpush1.msra.mxu0 %v3366_v20 }
 0x37b   :  { %1467 = vmatprep.subr.mxu0 %v3369_v43 }
 0x37c   :  { %1468 = vmatpush1.msra.mxu0 %v3372_v45 }
 0x37d   :  { %1469 = vmatprep.subr.mxu0 %v3375_v22 }
 0x37e   :  { %1470 = vmatpush1.msra.mxu0 %v3377_v24 }
 0x37f   :  { %1471 = vmatprep.subr.mxu0 %v3379_v47 }
 0x380   :  { %1472 = vmatpush1.msra.mxu0 %v3382_v49 }
 0x381   :  { %1473 = vmatprep.subr.mxu0 %v3385_v26 }
 0x382   :  { %1474 = vmatpush1.msra.mxu0 %v3388_v28 }
 0x383   :  { %1475 = vmatprep.subr.mxu0 %v3391_v51 }
 0x384   :  { %1476 = vmatpush1.msra.mxu0 %v3394_v53 }
 0x385   :  { %1477 = vmatprep.subr.mxu0 %v3397_v30 }
 0x386   :  { %1478 = vmatpush1.msra.mxu0 %v3400_v54 }
 0x387   :  { %1479 = vmatprep.subr.mxu0 %v3403_v21 }
 0x388   :  { %1480 = vmatpush1.msra.mxu0 %v3406_v17  ;;  %v4052_v17 = vld [vmem:[#allocation29_spill] sm:$0xff] }
 0x389   :  { %1481 = vmatprep.subr.mxu0 %v3409_v19  ;;  %v4051_v19 = vld [vmem:[#allocation18_spill] sm:$0xff] }
 0x38a   :  { %1482 = vmatpush1.msra.mxu0 %v3412_v32 }
 0x38b   :  { %1483 = vmatprep.subr.mxu0 %v3415_v61 }
 0x38c   :  { %1484 = vmatpush1.msra.mxu0 %v3418_v38 }
 0x38d   :  { %1485 = vmatprep.subr.mxu0 %v3421_v50  ;;  %v4050_v50 = vld [vmem:[#allocation17_spill] sm:$0xff] }
 0x38e   :  { %1486 = vmatpush1.msra.mxu0 %v3424_v59 }
 0x38f   :  { %1694 = vmatprep.subr.mxu0 %v3333_v33  ;;  %v3612_v33 = vld [vmem:[#allocation9 + $0x1b0] sm:$0xff] }
 0x390   :  { %1531 = vmatpush1.msra.mxu1 %v3612_v33 }
 0x391   :  { %1532 = vmatprep.subr.mxu1 %v3615_v5 }
 0x392   :  { %1533 = vmatpush1.msra.mxu1 %v3618_v63 }
 0x393   :  { %1534 = vmatprep.subr.mxu1 %v3621_v8 }
 0x394   :  { %1535 = vmatpush1.msra.mxu1 %v3624_v60 }
 0x395   :  { %1536 = vmatprep.subr.mxu1 %v3485_v2 }
 0x396   :  { %1537 = vmatpush1.msra.mxu1 %v3488_v23 }
 0x397   :  { %1538 = vmatprep.subr.mxu1 %v3491_v25 }
 0x398   :  { %1539 = vmatpush1.msra.mxu1 %v3494_v3 }
 0x399   :  { %1540 = vmatprep.subr.mxu1 %v3497_v27 }
 0x39a   :  { %1541 = vmatpush1.msra.mxu1 %v3499_v29 }
 0x39b   :  { %1542 = vmatprep.subr.mxu1 %v3501_v1 }
 0x39c   :  { %1543 = vmatpush1.msra.mxu1 %v3504_v7 }
 0x39d   :  { %1544 = vmatprep.subr.mxu1 %v3507_v31 }
 0x39e   :  { %1545 = vmatpush1.msra.mxu1 %v3510_v48 }
 0x39f   :  { %1546 = vmatprep.subr.mxu1 %v3513_v10 }
 0x3a0   :  { %1547 = vmatpush1.msra.mxu1 %v3516_v4 }
 0x3a1   :  { %1548 = vmatprep.subr.mxu1 %v4040_v44 }
 0x3a2   :  { %1549 = vmatpush1.msra.mxu1 %v4041_v0 }
 0x3a3   :  { %1550 = vmatprep.subr.mxu1 %v4042_v13  ;;  %v4053_v13 = vld [vmem:[#allocation28_spill] sm:$0xff] }
 0x3a4   :  { %1551 = vmatpush1.msra.mxu1 %v4043_v15 }
 0x3a5   :  { %1552 = vmatprep.subr.mxu1 %v4044_v6 }
 0x3a6   :  { %1553 = vmatpush1.msra.mxu1 %v4045_v55 }
 0x3a7   :  { %1554 = vmatprep.subr.mxu1 %v4046_v11 }
 0x3a8   :  { %1555 = vmatpush1.msra.mxu1 %v4047_v56 }
 0x3a9   :  { %1556 = vmatprep.subr.mxu1 %v4048_v58 }
 0x3aa   :  { %1557 = vmatpush1.msra.mxu1 %v4049_v34 }
 0x3ab   :  { %1765 = vmatprep.subr.mxu1 %v3597_v36 }
 0x42f   :  { %v1282_v59 = vpop.f32.mrf.mxu0  ;;  %v1353_v6 = vpop.f32.mrf.mxu1 }
 0x430   :  { %v1358_v38 = vadd.f32 %v1282_v59, %v4050_v50  ;;  %v1360_v58 = vadd.f32 %v1353_v6, %v4053_v13 }
 0x431   :  { %v1284_v61 = vpop.f32.mrf.mxu0  ;;  %v1355_v11 = vpop.f32.mrf.mxu1 }
 0x432   :  { %v2523_v32 = vmul.f32 -1.442695, %v1358_v38  ;;  %v1359_v15 = vadd.f32 %v1284_v61, %v4051_v19  ;;  %v1361_v56 = vadd.f32 %v1355_v11, %v4052_v17 }
 0x434   :  { %2665 = vpow2.f32 %v2523_v32  ;;  %v2524_v55 = vmul.f32 -1.442695, %v1359_v15  ;;  %v2525_v21 = vmul.f32 -1.442695, %v1361_v56  ;;  %v4075_v56 = vld [vmem:[#allocation31_spill] sm:$0xff] }
 0x436   :  { %2667 = vpow2.f32 %v2524_v55 }
 0x437   :  { %2669 = vtanh.f32 %v1360_v58 }
 0x438   :  { %2671 = vpow2.f32 %v2525_v21 }
 0x441   :  { %v2666_v34 = vpop.eup %2665 }
 0x442   :  { %v1365_v0 = vadd.f32 1.0, %v2666_v34 }
 0x443   :  { %v2668_v36 = vpop.eup %2667 }
 0x444   :  { %2673 = vrcp.f32 %v1365_v0  ;;  %v1371_v50 = vadd.f32 1.0, %v2668_v36  ;;  %v2670_v38 = vpop.eup %2669 }
 0x445   :  { %v2672_v19 = vpop.eup %2671 }
 0x446   :  { %2675 = vrcp.f32 %v1371_v50  ;;  %v1378_v15 = vadd.f32 1.0, %v2672_v19 }
 0x448   :  { %2677 = vrcp.f32 %v1378_v15 }
 0x451   :  { %v2674_v32 = vpop.eup %2673 }
 0x452   :  { %v1382_v61 = vmul.f32 %v2674_v32, %v2670_v38  ;;  %v4076_v38 = vld [vmem:[#allocation30_spill] sm:$0xff] }
 0x453   :  { %v2676_v59 = vpop.eup %2675 }
 0x454   :  { %v1381_v55 = vmul.f32 %v2676_v59, %v3556_v57  ;;  %v4074_v57 = vld [vmem:[#allocation20_spill] sm:$0xff] }
 0x455   :  { %v2678_v34 = vpop.eup %2677 }
 0x456   :  { %v3655_v17 = vadd.f32 %v1382_v61, %v1381_v55 }
 0x458   :  { %2679 = vtanh.f32 %v3655_v17 }
 0x465   :  { %v2680_v58 = vpop.eup %2679 }
 0x466   :  { %v3658_v13 = vmul.f32 %v2680_v58, %v2678_v34 }
 0x468   :  { %1520 = vmatmul.mubr.f32.vlgmr.msra.gmra.mxu0 %v3658_v13  ;;  %1591 = vmatmul.mubr.f32.vlgmr.msra.gmra.mxu1 %v3658_v13 }
 0x469   :  { %1695 = vmatpush1.msra.mxu0 %v3336_v9  ;;  %1766 = vmatpush1.msra.mxu1 %v3600_v42  ;;  %v4054_v9 = vld [vmem:[#allocation49_spill] sm:$0xff] }
 0x46a   :  { %1696 = vmatprep.subr.mxu0 %v3339_v12  ;;  %1767 = vmatprep.subr.mxu1 %v3603_v46  ;;  %v4055_v12 = vld [vmem:[#allocation39_spill] sm:$0xff] }
 0x46b   :  { %1697 = vmatpush1.msra.mxu0 %v3342_v35  ;;  %1768 = vmatpush1.msra.mxu1 %v3606_v40  ;;  %v4056_v35 = vld [vmem:[#allocation50_spill] sm:$0xff] }
 0x46c   :  { %1698 = vmatprep.subr.mxu0 %v3345_v37  ;;  %1769 = vmatprep.subr.mxu1 %v3609_v52  ;;  %v4057_v37 = vld [vmem:[#allocation40_spill] sm:$0xff] }
 0x46d   :  { %1699 = vmatpush1.msra.mxu0 %v3348_v62  ;;  %1770 = vmatpush1.msra.mxu1 %v3612_v33  ;;  %v4058_v62 = vld [vmem:[#allocation51_spill] sm:$0xff] }
 0x46e   :  { %1700 = vmatprep.subr.mxu0 %v3351_v14  ;;  %1771 = vmatprep.subr.mxu1 %v3615_v5  ;;  %v4059_v14 = vld [vmem:[#allocation41_spill] sm:$0xff] }
 0x46f   :  { %1701 = vmatpush1.msra.mxu0 %v3354_v16  ;;  %1772 = vmatpush1.msra.mxu1 %v3618_v63  ;;  %v4060_v16 = vld [vmem:[#allocation52_spill] sm:$0xff] }
 0x470   :  { %1702 = vmatprep.subr.mxu0 %v3357_v39  ;;  %1773 = vmatprep.subr.mxu1 %v3621_v8  ;;  %v4061_v39 = vld [vmem:[#allocation42_spill] sm:$0xff] }
 0x471   :  { %1703 = vmatpush1.msra.mxu0 %v3360_v41  ;;  %1774 = vmatpush1.msra.mxu1 %v3624_v60  ;;  %v4062_v41 = vld [vmem:[#allocation53_spill] sm:$0xff] }
 0x472   :  { %1704 = vmatprep.subr.mxu0 %v3363_v18  ;;  %1775 = vmatprep.subr.mxu1 %v3485_v2  ;;  %v4063_v18 = vld [vmem:[#allocation43_spill] sm:$0xff] }
 0x473   :  { %1705 = vmatpush1.msra.mxu0 %v3366_v20  ;;  %1776 = vmatpush1.msra.mxu1 %v3488_v23  ;;  %v4064_v20 = vld [vmem:[#allocation54_spill] sm:$0xff] }
 0x474   :  { %1706 = vmatprep.subr.mxu0 %v3369_v43  ;;  %1777 = vmatprep.subr.mxu1 %v3491_v25  ;;  %v4065_v43 = vld [vmem:[#allocation44_spill] sm:$0xff] }
 0x475   :  { %1707 = vmatpush1.msra.mxu0 %v3372_v45  ;;  %1778 = vmatpush1.msra.mxu1 %v3494_v3  ;;  %v4066_v45 = vld [vmem:[#allocation55_spill] sm:$0xff] }
 0x476   :  { %1708 = vmatprep.subr.mxu0 %v3375_v22  ;;  %1779 = vmatprep.subr.mxu1 %v3497_v27  ;;  %v4067_v22 = vld [vmem:[#allocation45_spill] sm:$0xff] }
 0x477   :  { %1709 = vmatpush1.msra.mxu0 %v3377_v24  ;;  %1780 = vmatpush1.msra.mxu1 %v3499_v29  ;;  %v4068_v24 = vld [vmem:[#allocation56_spill] sm:$0xff] }
 0x478   :  { %1710 = vmatprep.subr.mxu0 %v3379_v47  ;;  %1781 = vmatprep.subr.mxu1 %v3501_v1  ;;  %v4069_v47 = vld [vmem:[#allocation46_spill] sm:$0xff] }
 0x479   :  { %1711 = vmatpush1.msra.mxu0 %v3382_v49  ;;  %1782 = vmatpush1.msra.mxu1 %v3504_v7  ;;  %v4070_v49 = vmov 0.0  }
 0x47a   :  { %1712 = vmatprep.subr.mxu0 %v3385_v26  ;;  %1783 = vmatprep.subr.mxu1 %v3507_v31  ;;  %v4071_v26 = vld [vmem:[#allocation57_spill] sm:$0xff] }
 0x47b   :  { %1713 = vmatpush1.msra.mxu0 %v3388_v28  ;;  %1784 = vmatpush1.msra.mxu1 %v3510_v48  ;;  %v4072_v28 = vld [vmem:[#allocation58_spill] sm:$0xff] }
 0x47c   :  { %1714 = vmatprep.subr.mxu0 %v3391_v51  ;;  %1785 = vmatprep.subr.mxu1 %v3513_v10 }
 0x47d   :  { %1715 = vmatpush1.msra.mxu0 %v3394_v53  ;;  %1786 = vmatpush1.msra.mxu1 %v3516_v4  ;;  %v4073_v53 = vld [vmem:[#allocation19_spill] sm:$0xff] }
 0x47e   :  { %1716 = vmatprep.subr.mxu0 %v3397_v30  ;;  %1787 = vmatprep.subr.mxu1 %v4040_v44 }
 0x47f   :  { %1717 = vmatpush1.msra.mxu0 %v3400_v54  ;;  %1788 = vmatpush1.msra.mxu1 %v4054_v9 }
 0x480   :  { %1718 = vmatprep.subr.mxu0 %v4055_v12  ;;  %1789 = vmatprep.subr.mxu1 %v4056_v35 }
 0x481   :  { %1719 = vmatpush1.msra.mxu0 %v4057_v37  ;;  %1790 = vmatpush1.msra.mxu1 %v4058_v62 }
 0x482   :  { %1720 = vmatprep.subr.mxu0 %v4059_v14  ;;  %1791 = vmatprep.subr.mxu1 %v4060_v16 }
 0x483   :  { %1721 = vmatpush1.msra.mxu0 %v4061_v39  ;;  %1792 = vmatpush1.msra.mxu1 %v4062_v41 }
 0x484   :  { %1722 = vmatprep.subr.mxu0 %v4063_v18  ;;  %1793 = vmatprep.subr.mxu1 %v4064_v20 }
 0x485   :  { %1723 = vmatpush1.msra.mxu0 %v4065_v43  ;;  %1794 = vmatpush1.msra.mxu1 %v4066_v45 }
 0x486   :  { %1724 = vmatprep.subr.mxu0 %v4067_v22  ;;  %1795 = vmatprep.subr.mxu1 %v4068_v24 }
 0x487   :  { %1725 = vmatpush1.msra.mxu0 %v4069_v47  ;;  %1758 = vmatprep.mubr.f32.mxu0 %v4070_v49 }
 0x488   :  { %1796 = vmatpush1.msra.mxu1 %v4071_v26  ;;  %1829 = vmatprep.mubr.f32.mxu1 %v4070_v49 }
 0x489   :  { %2004 = vmatprep.subr.mxu1 %v4072_v28 }
 0x528   :  { %v1521_v51 = vpop.f32.mrf.mxu0  ;;  %v1592_v0 = vpop.f32.mrf.mxu1 }
 0x529   :  { %v1597_v30 = vadd.f32 %v1521_v51, %v4073_v53  ;;  %v1599_v19 = vadd.f32 %v1592_v0, %v4076_v38  ;;  %v3843_v53 = vld [vmem:[#allocation9 + $0x68] sm:$0xff] }
 0x52a   :  { %v1523_v54 = vpop.f32.mrf.mxu0  ;;  %v1594_v11 = vpop.f32.mrf.mxu1  ;;  %v3861_v0 = vld [vmem:[#allocation9 + $0x8] sm:$0xff] }
 0x52b   :  { %v2526_v21 = vmul.f32 -1.442695, %v1597_v30  ;;  %v1598_v36 = vadd.f32 %v1523_v54, %v4074_v57  ;;  %v1600_v50 = vadd.f32 %v1594_v11, %v4075_v56  ;;  %v3846_v30 = vld [vmem:[#allocation9 + $0x60] sm:$0xff]  ;;  %v3849_v54 = vld [vmem:[#allocation9 + $0x48] sm:$0xff] }
 0x52c   :  { %v3855_v57 = vld [vmem:[#allocation9 + $0x28] sm:$0xff]  ;;  %v4077_v56 = vld [vmem:[#allocation21_spill] sm:$0xff] }
 0x52d   :  { %2681 = vpow2.f32 %v2526_v21  ;;  %v2527_v6 = vmul.f32 -1.442695, %v1598_v36  ;;  %v2528_v32 = vmul.f32 -1.442695, %v1600_v50  ;;  %v3852_v21 = vld [vmem:[#allocation9 + $0x40] sm:$0xff] }
 0x52e   :  { %v3858_v36 = vld [vmem:[#allocation9 + $0x20] sm:$0xff] }
 0x52f   :  { %2683 = vpow2.f32 %v2527_v6  ;;  %v3864_v6 = vld [vmem:[#allocation9] sm:$0xff] }
 0x530   :  { %2685 = vtanh.f32 %v1599_v19 }
 0x531   :  { %2687 = vpow2.f32 %v2528_v32  ;;  %v4078_v32 = vld [vmem:[#allocation22_spill] sm:$0xff] }
 0x53a   :  { %v2682_v61 = vpop.eup %2681 }
 0x53b   :  { %v1604_v59 = vadd.f32 1.0, %v2682_v61 }
 0x53c   :  { %v2684_v15 = vpop.eup %2683 }
 0x53d   :  { %2689 = vrcp.f32 %v1604_v59  ;;  %v1610_v55 = vadd.f32 1.0, %v2684_v15  ;;  %v2686_v34 = vpop.eup %2685 }
 0x53e   :  { %v2688_v58 = vpop.eup %2687 }
 0x53f   :  { %2691 = vrcp.f32 %v1610_v55  ;;  %v1617_v39 = vadd.f32 1.0, %v2688_v58 }
 0x541   :  { %2693 = vrcp.f32 %v1617_v39 }
 0x54a   :  { %v2690_v12 = vpop.eup %2689 }
 0x54b   :  { %v1621_v37 = vmul.f32 %v2690_v12, %v2686_v34  ;;  %v4079_v34 = vld [vmem:[#allocation33_spill] sm:$0xff]  ;;  %v4080_v12 = vld [vmem:[#allocation32_spill] sm:$0xff] }
 0x54c   :  { %v2692_v14 = vpop.eup %2691 }
 0x54d   :  { %v1620_v18 = vmul.f32 %v2692_v14, %v3655_v17  ;;  %v3812_v17 = vld [vmem:[#allocation9 + $0x120] sm:$0xff] }
 0x54e   :  { %v2694_v22 = vpop.eup %2693 }
 0x54f   :  { %v3732_v43 = vadd.f32 %v1621_v37, %v1620_v18 }
 0x551   :  { %2695 = vtanh.f32 %v3732_v43 }
 0x55e   :  { %v2696_v47 = vpop.eup %2695 }
 0x55f   :  { %v3735_v51 = vmul.f32 %v2696_v47, %v2694_v22 }
 0x561   :  { %1759 = vmatmul.mubr.f32.vlgmr.msra.gmra.mxu0 %v3735_v51  ;;  %1830 = vmatmul.mubr.f32.vlgmr.msra.gmra.mxu1 %v3735_v51 }
 0x562   :  { %2005 = vmatpush1.msra.mxu1 %v3600_v42  ;;  %1997 = vmatprep.mubr.f32.mxu0 %v4070_v49 }
 0x563   :  { %2006 = vmatprep.subr.mxu1 %v3603_v46  ;;  %2068 = vmatprep.mubr.f32.mxu1 %v4070_v49 }
 0x564   :  { %2007 = vmatpush1.msra.mxu1 %v3606_v40 }
 0x565   :  { %2008 = vmatprep.subr.mxu1 %v3609_v52 }
 0x566   :  { %2009 = vmatpush1.msra.mxu1 %v3612_v33 }
 0x567   :  { %2010 = vmatprep.subr.mxu1 %v3615_v5 }
 0x568   :  { %2011 = vmatpush1.msra.mxu1 %v3618_v63 }
 0x569   :  { %2012 = vmatprep.subr.mxu1 %v3621_v8 }
 0x56a   :  { %2013 = vmatpush1.msra.mxu1 %v3624_v60 }
 0x56b   :  { %2014 = vmatprep.subr.mxu1 %v3485_v2  ;;  %v3773_v2 = vld [vmem:[#allocation9 + $0x1e8] sm:$0xff] }
 0x56c   :  { %2015 = vmatpush1.msra.mxu1 %v3488_v23  ;;  %1933 = vmatprep.subr.mxu0 %v3773_v2  ;;  %v3776_v23 = vld [vmem:[#allocation9 + $0x1e0] sm:$0xff] }
 0x56d   :  { %2016 = vmatprep.subr.mxu1 %v3491_v25  ;;  %1934 = vmatpush1.msra.mxu0 %v3776_v23  ;;  %v3779_v25 = vld [vmem:[#allocation9 + $0x1c8] sm:$0xff] }
 0x56e   :  { %2017 = vmatpush1.msra.mxu1 %v3494_v3  ;;  %1935 = vmatprep.subr.mxu0 %v3779_v25  ;;  %v3782_v3 = vld [vmem:[#allocation9 + $0x1c0] sm:$0xff] }
 0x56f   :  { %2018 = vmatprep.subr.mxu1 %v3497_v27  ;;  %1936 = vmatpush1.msra.mxu0 %v3782_v3  ;;  %v3785_v27 = vld [vmem:[#allocation9 + $0x1a8] sm:$0xff] }
 0x570   :  { %2019 = vmatpush1.msra.mxu1 %v3499_v29  ;;  %1937 = vmatprep.subr.mxu0 %v3785_v27  ;;  %v3788_v29 = vld [vmem:[#allocation9 + $0x1a0] sm:$0xff] }
 0x571   :  { %2020 = vmatprep.subr.mxu1 %v3501_v1  ;;  %1938 = vmatpush1.msra.mxu0 %v3788_v29  ;;  %v3791_v1 = vld [vmem:[#allocation9 + $0x188] sm:$0xff] }
 0x572   :  { %2021 = vmatpush1.msra.mxu1 %v3504_v7  ;;  %1939 = vmatprep.subr.mxu0 %v3791_v1  ;;  %v3794_v7 = vld [vmem:[#allocation9 + $0x180] sm:$0xff] }
 0x573   :  { %2022 = vmatprep.subr.mxu1 %v3507_v31  ;;  %1940 = vmatpush1.msra.mxu0 %v3794_v7  ;;  %v3797_v31 = vld [vmem:[#allocation9 + $0x168] sm:$0xff] }
 0x574   :  { %2023 = vmatpush1.msra.mxu1 %v3510_v48  ;;  %1941 = vmatprep.subr.mxu0 %v3797_v31  ;;  %v3800_v48 = vld [vmem:[#allocation9 + $0x160] sm:$0xff] }
 0x575   :  { %2024 = vmatprep.subr.mxu1 %v3513_v10  ;;  %1942 = vmatpush1.msra.mxu0 %v3800_v48  ;;  %v3803_v10 = vld [vmem:[#allocation9 + $0x148] sm:$0xff] }
 0x576   :  { %2025 = vmatpush1.msra.mxu1 %v3516_v4  ;;  %1943 = vmatprep.subr.mxu0 %v3803_v10  ;;  %v3806_v4 = vld [vmem:[#allocation9 + $0x140] sm:$0xff] }
 0x577   :  { %2026 = vmatprep.subr.mxu1 %v4040_v44  ;;  %1944 = vmatpush1.msra.mxu0 %v3806_v4  ;;  %v3809_v44 = vld [vmem:[#allocation9 + $0x128] sm:$0xff] }
 0x578   :  { %2027 = vmatpush1.msra.mxu1 %v4054_v9  ;;  %1945 = vmatprep.subr.mxu0 %v3809_v44  ;;  %v3815_v9 = vld [vmem:[#allocation9 + $0x108] sm:$0xff] }
 0x579   :  { %2028 = vmatprep.subr.mxu1 %v4056_v35  ;;  %1946 = vmatpush1.msra.mxu0 %v3812_v17  ;;  %v3817_v35 = vld [vmem:[#allocation9 + $0x100] sm:$0xff] }
 0x57a   :  { %2029 = vmatpush1.msra.mxu1 %v4058_v62  ;;  %v3819_v62 = vld [vmem:[#allocation9 + $0xe8] sm:$0xff]  ;;  %1947 = vmatprep.subr.mxu0 %v3815_v9 }
 0x57b   :  { %2030 = vmatprep.subr.mxu1 %v4060_v16  ;;  %v3822_v16 = vld [vmem:[#allocation9 + $0xe0] sm:$0xff]  ;;  %1948 = vmatpush1.msra.mxu0 %v3817_v35 }
 0x57c   :  { %2031 = vmatpush1.msra.mxu1 %v4062_v41  ;;  %v3825_v41 = vld [vmem:[#allocation9 + $0xc8] sm:$0xff]  ;;  %1949 = vmatprep.subr.mxu0 %v3819_v62 }
 0x57d   :  { %2032 = vmatprep.subr.mxu1 %v4064_v20  ;;  %v3828_v20 = vld [vmem:[#allocation9 + $0xc0] sm:$0xff]  ;;  %1950 = vmatpush1.msra.mxu0 %v3822_v16 }
 0x57e   :  { %2033 = vmatpush1.msra.mxu1 %v4066_v45  ;;  %v3831_v45 = vld [vmem:[#allocation9 + $0xa8] sm:$0xff]  ;;  %1951 = vmatprep.subr.mxu0 %v3825_v41 }
 0x57f   :  { %2034 = vmatprep.subr.mxu1 %v4068_v24  ;;  %v3834_v24 = vld [vmem:[#allocation9 + $0xa0] sm:$0xff]  ;;  %1952 = vmatpush1.msra.mxu0 %v3828_v20 }
 0x580   :  { %2035 = vmatpush1.msra.mxu1 %v4071_v26  ;;  %v3837_v26 = vld [vmem:[#allocation9 + $0x88] sm:$0xff]  ;;  %1953 = vmatprep.subr.mxu0 %v3831_v45 }
 0x581   :  { %2243 = vmatprep.subr.mxu1 %v4072_v28  ;;  %v3840_v28 = vld [vmem:[#allocation9 + $0x80] sm:$0xff]  ;;  %1954 = vmatpush1.msra.mxu0 %v3834_v24 }
 0x582   :  { %1955 = vmatprep.subr.mxu0 %v3837_v26 }
 0x583   :  { %1956 = vmatpush1.msra.mxu0 %v3840_v28 }
 0x584   :  { %1957 = vmatprep.subr.mxu0 %v3843_v53 }
 0x585   :  { %1958 = vmatpush1.msra.mxu0 %v3846_v30 }
 0x586   :  { %1959 = vmatprep.subr.mxu0 %v3849_v54 }
 0x587   :  { %1960 = vmatpush1.msra.mxu0 %v3852_v21 }
 0x588   :  { %1961 = vmatprep.subr.mxu0 %v3855_v57 }
 0x589   :  { %1962 = vmatpush1.msra.mxu0 %v3858_v36 }
 0x58a   :  { %1963 = vmatprep.subr.mxu0 %v3861_v0 }
 0x58b   :  { %1964 = vmatpush1.msra.mxu0 %v3864_v6 }
 0x58c   :  { %2172 = vmatprep.subr.mxu0 %v3773_v2 }
 0x621   :  { %v1760_v11 = vpop.f32.mrf.mxu0  ;;  %v1831_v59 = vpop.f32.mrf.mxu1 }
 0x622   :  { %v1836_v50 = vadd.f32 %v1760_v11, %v4077_v56  ;;  %v1838_v37 = vadd.f32 %v1831_v59, %v4080_v12 }
 0x623   :  { %v1762_v38 = vpop.f32.mrf.mxu0  ;;  %v1833_v55 = vpop.f32.mrf.mxu1 }
 0x624   :  { %v2529_v19 = vmul.f32 -1.442695, %v1836_v50  ;;  %v1837_v61 = vadd.f32 %v1762_v38, %v4078_v32  ;;  %v1839_v58 = vadd.f32 %v1833_v55, %v4079_v34 }
 0x626   :  { %2697 = vpow2.f32 %v2529_v19  ;;  %v2530_v15 = vmul.f32 -1.442695, %v1837_v61  ;;  %v2531_v14 = vmul.f32 -1.442695, %v1839_v58 }
 0x628   :  { %2699 = vpow2.f32 %v2530_v15 }
 0x629   :  { %2701 = vtanh.f32 %v1838_v37 }
 0x62a   :  { %2703 = vpow2.f32 %v2531_v14 }
 0x633   :  { %v2698_v39 = vpop.eup %2697 }
 0x634   :  { %v1843_v18 = vadd.f32 1.0, %v2698_v39 }
 0x635   :  { %v2700_v22 = vpop.eup %2699 }
 0x636   :  { %2705 = vrcp.f32 %v1843_v18  ;;  %v1849_v47 = vadd.f32 1.0, %v2700_v22  ;;  %v2702_v2 = vpop.eup %2701 }
 0x637   :  { %v2704_v11 = vpop.eup %2703 }
 0x638   :  { %2707 = vrcp.f32 %v1849_v47  ;;  %v1856_v19 = vadd.f32 1.0, %v2704_v11 }
 0x63a   :  { %2709 = vrcp.f32 %v1856_v19  ;;  %v2372_v19 = vld [vmem:[#allocation10 + $0x68] sm:$0xff] }
 0x643   :  { %v2706_v56 = vpop.eup %2705 }
 0x644   :  { %v1860_v50 = vmul.f32 %v2706_v56, %v2702_v2  ;;  %v2373_v56 = vld [vmem:[#allocation10 + $0x70] sm:$0xff] }
 0x645   :  { %v2708_v38 = vpop.eup %2707 }
 0x646   :  { %v1859_v32 = vmul.f32 %v2708_v38, %v3732_v43  ;;  %v2131_v43 = vld [vmem:[#allocation9 + $0xb8] sm:$0xff] }
 0x647   :  { %v2710_v59 = vpop.eup %2709 }
 0x648   :  { %v3875_v61 = vadd.f32 %v1860_v50, %v1859_v32  ;;  %v4085_v50 = vld [vmem:[#allocation38_spill] sm:$0xff]  ;;  %v2371_v32 = vld [vmem:[#allocation10 + $0x60] sm:$0xff] }
 0x649   :  { %v2351_v38 = vmax.f32 %v4085_v50, 0.0 }
 0x64a   :  { %2711 = vtanh.f32 %v3875_v61 }
 0x657   :  { %v2712_v15 = vpop.eup %2711 }
 0x658   :  { %v3878_v55 = vmul.f32 %v2712_v15, %v2710_v59  ;;  %v2369_v59 = vld [vmem:[#allocation10 + $0x50] sm:$0xff]  ;;  %v2368_v15 = vld [vmem:[#allocation10 + $0x48] sm:$0xff] }
 0x65a   :  { %1998 = vmatmul.mubr.f32.vlgmr.msra.gmra.mxu0 %v3878_v55  ;;  %2069 = vmatmul.mubr.f32.vlgmr.msra.gmra.mxu1 %v3878_v55 }
 0x65b   :  { %2173 = vmatpush1.msra.mxu0 %v3776_v23  ;;  %2244 = vmatpush1.msra.mxu1 %v3600_v42  ;;  %v2151_v42 = vld [vmem:[#allocation9 + $0x158] sm:$0xff]  ;;  %v2130_v23 = vld [vmem:[#allocation9 + $0xb0] sm:$0xff] }
 0x65c   :  { %2174 = vmatprep.subr.mxu0 %v3779_v25  ;;  %2245 = vmatprep.subr.mxu1 %v3603_v46  ;;  %v2150_v46 = vld [vmem:[#allocation9 + $0x150] sm:$0xff]  ;;  %v2127_v25 = vld [vmem:[#allocation9 + $0x98] sm:$0xff] }
 0x65d   :  { %2175 = vmatpush1.msra.mxu0 %v3782_v3  ;;  %2246 = vmatpush1.msra.mxu1 %v3606_v40  ;;  %v2147_v40 = vld [vmem:[#allocation9 + $0x138] sm:$0xff] }
 0x65e   :  { %2176 = vmatprep.subr.mxu0 %v3785_v27  ;;  %2247 = vmatprep.subr.mxu1 %v3609_v52  ;;  %v2146_v52 = vld [vmem:[#allocation9 + $0x130] sm:$0xff]  ;;  %v2374_v3 = vld [vmem:[#allocation10 + $0x78] sm:$0xff] }
 0x65f   :  { %2177 = vmatpush1.msra.mxu0 %v3788_v29  ;;  %2248 = vmatpush1.msra.mxu1 %v3612_v33  ;;  %v2143_v33 = vld [vmem:[#allocation9 + $0x118] sm:$0xff]  ;;  %v2126_v27 = vld [vmem:[#allocation9 + $0x90] sm:$0xff] }
 0x660   :  { %2178 = vmatprep.subr.mxu0 %v3791_v1  ;;  %2249 = vmatprep.subr.mxu1 %v3615_v5  ;;  %v2142_v5 = vld [vmem:[#allocation9 + $0x110] sm:$0xff]  ;;  %v2123_v29 = vld [vmem:[#allocation9 + $0x78] sm:$0xff] }
 0x661   :  { %2179 = vmatpush1.msra.mxu0 %v3794_v7  ;;  %2250 = vmatpush1.msra.mxu1 %v3618_v63  ;;  %v2139_v63 = vld [vmem:[#allocation9 + $0xf8] sm:$0xff]  ;;  %v2122_v1 = vld [vmem:[#allocation9 + $0x70] sm:$0xff] }
 0x662   :  { %2180 = vmatprep.subr.mxu0 %v3797_v31  ;;  %2251 = vmatprep.subr.mxu1 %v3621_v8  ;;  %v2138_v8 = vld [vmem:[#allocation9 + $0xf0] sm:$0xff]  ;;  %v2119_v7 = vld [vmem:[#allocation9 + $0x58] sm:$0xff] }
 0x663   :  { %2181 = vmatpush1.msra.mxu0 %v3800_v48  ;;  %2252 = vmatpush1.msra.mxu1 %v3624_v60  ;;  %v2135_v60 = vld [vmem:[#allocation9 + $0xd8] sm:$0xff]  ;;  %v2118_v31 = vld [vmem:[#allocation9 + $0x50] sm:$0xff] }
 0x664   :  { %2182 = vmatprep.subr.mxu0 %v3803_v10  ;;  %2236 = vmatprep.mubr.f32.mxu0 %v4070_v49  ;;  %v2115_v48 = vld [vmem:[#allocation9 + $0x38] sm:$0xff]  ;;  %v2114_v10 = vld [vmem:[#allocation9 + $0x30] sm:$0xff] }
 0x665   :  { %2183 = vmatpush1.msra.mxu0 %v3806_v4  ;;  %2307 = vmatprep.mubr.f32.mxu1 %v4070_v49  ;;  %v2134_v49 = vld [vmem:[#allocation9 + $0xd0] sm:$0xff]  ;;  %v2111_v4 = vld [vmem:[#allocation9 + $0x18] sm:$0xff] }
 0x666   :  { %2184 = vmatprep.subr.mxu0 %v3809_v44  ;;  %2253 = vmatprep.subr.mxu1 %v2151_v42  ;;  %v2110_v44 = vld [vmem:[#allocation9 + $0x10] sm:$0xff]  ;;  %v2367_v42 = vld [vmem:[#allocation10 + $0x40] sm:$0xff] }
 0x667   :  { %2185 = vmatpush1.msra.mxu0 %v3812_v17  ;;  %2254 = vmatpush1.msra.mxu1 %v2150_v46  ;;  %v2366_v46 = vld [vmem:[#allocation10 + $0x38] sm:$0xff] }
 0x668   :  { %2186 = vmatprep.subr.mxu0 %v3815_v9  ;;  %2255 = vmatprep.subr.mxu1 %v2147_v40  ;;  %v4081_v9 = vld [vmem:[#allocation23_spill] sm:$0xff] }
 0x669   :  { %2187 = vmatpush1.msra.mxu0 %v3817_v35  ;;  %2256 = vmatpush1.msra.mxu1 %v2146_v52  ;;  %v2365_v40 = vld [vmem:[#allocation10 + $0x30] sm:$0xff]  ;;  %v2364_v52 = vld [vmem:[#allocation10 + $0x28] sm:$0xff] }
 0x66a   :  { %2188 = vmatprep.subr.mxu0 %v3819_v62  ;;  %2257 = vmatprep.subr.mxu1 %v2143_v33  ;;  %v2363_v33 = vld [vmem:[#allocation10 + $0x20] sm:$0xff] }
 0x66b   :  { %2189 = vmatpush1.msra.mxu0 %v3822_v16  ;;  %2258 = vmatpush1.msra.mxu1 %v2142_v5  ;;  %v2362_v5 = vld [vmem:[#allocation10 + $0x18] sm:$0xff] }
 0x66c   :  { %2190 = vmatprep.subr.mxu0 %v3825_v41  ;;  %2259 = vmatprep.subr.mxu1 %v2139_v63  ;;  %v4082_v41 = vld [vmem:[#allocation24_spill] sm:$0xff]  ;;  %v2361_v63 = vld [vmem:[#allocation10 + $0x10] sm:$0xff] }
 0x66d   :  { %2191 = vmatpush1.msra.mxu0 %v3828_v20  ;;  %2260 = vmatpush1.msra.mxu1 %v2138_v8  ;;  %v2360_v8 = vld [vmem:[#allocation10 + $0x8] sm:$0xff] }
 0x66e   :  { %2192 = vmatprep.subr.mxu0 %v3831_v45  ;;  %2261 = vmatprep.subr.mxu1 %v2135_v60  ;;  %v2359_v60 = vld [vmem:[#allocation10] sm:$0xff] }
 0x66f   :  { %2193 = vmatpush1.msra.mxu0 %v3834_v24  ;;  %2262 = vmatpush1.msra.mxu1 %v2134_v49  ;;  %v4086_v49 = vld [vmem:[#allocation47_spill] sm:$0xff] }
 0x670   :  { %2194 = vmatprep.subr.mxu0 %v3837_v26  ;;  %2263 = vmatprep.subr.mxu1 %v2131_v43  ;;  %v2352_v43 = vmax.f32 %v4086_v49, 0.0 }
 0x671   :  { %2195 = vmatpush1.msra.mxu0 %v3840_v28  ;;  %2264 = vmatpush1.msra.mxu1 %v2130_v23  ;;  %v4083_v28 = vld [vmem:[#allocation35_spill] sm:$0xff] }
 0x672   :  { %2196 = vmatprep.subr.mxu0 %v3843_v53  ;;  %2265 = vmatprep.subr.mxu1 %v2127_v25  ;;  %v4087_v23 = vld [vmem:[#allocation27_spill] sm:$0xff] }
 0x673   :  { %2197 = vmatpush1.msra.mxu0 %v3846_v30  ;;  %2266 = vmatpush1.msra.mxu1 %v2126_v27  ;;  %v4084_v30 = vld [vmem:[#allocation34_spill] sm:$0xff]  ;;  %v2353_v25 = vmax.f32 %v4087_v23, 0.0  ;;  %v2355_v27 = vmax.f32 %v3735_v51, 0.0  ;;  %v4090_v51 = vld [vmem:[#allocation37_spill] sm:$0xff] }
 0x674   :  { %2198 = vmatprep.subr.mxu0 %v3849_v54  ;;  %2267 = vmatprep.subr.mxu1 %v2123_v29  ;;  %v2356_v29 = vmax.f32 %v3878_v55, 0.0 }
 0x675   :  { %2199 = vmatpush1.msra.mxu0 %v3852_v21  ;;  %2268 = vmatpush1.msra.mxu1 %v2122_v1 }
 0x676   :  { %2200 = vmatprep.subr.mxu0 %v3855_v57  ;;  %2269 = vmatprep.subr.mxu1 %v2119_v7 }
 0x677   :  { %2201 = vmatpush1.msra.mxu0 %v3858_v36  ;;  %2270 = vmatpush1.msra.mxu1 %v2118_v31  ;;  %v4088_v31 = vld [vmem:[#allocation25_spill] sm:$0xff] }
 0x678   :  { %2202 = vmatprep.subr.mxu0 %v3861_v0  ;;  %2271 = vmatprep.subr.mxu1 %v2115_v48 }
 0x679   :  { %2203 = vmatpush1.msra.mxu0 %v3864_v6  ;;  %2272 = vmatpush1.msra.mxu1 %v2114_v10 }
 0x67a   :  { %2563 = vmatprep.subr.mxu0 %v2374_v3  ;;  %2273 = vmatprep.subr.mxu1 %v2111_v4 }
 0x67b   :  { %2274 = vmatpush1.msra.mxu1 %v2110_v44  ;;  %v4089_v44 = vld [vmem:[#allocation26_spill] sm:$0xff] }
 0x71a   :  { %v1999_v17 = vpop.f32.mrf.mxu0  ;;  %v2070_v45 = vpop.f32.mrf.mxu1 }
 0x71b   :  { %v2075_v35 = vadd.f32 %v1999_v17, %v4081_v9  ;;  %v2077_v54 = vadd.f32 %v2070_v45, %v4084_v30 }
 0x71c   :  { %v2001_v62 = vpop.f32.mrf.mxu0  ;;  %v2072_v26 = vpop.f32.mrf.mxu1 }
 0x71d   :  { %v2532_v16 = vmul.f32 -1.442695, %v2075_v35  ;;  %v2076_v20 = vadd.f32 %v2001_v62, %v4082_v41  ;;  %v2078_v53 = vadd.f32 %v2072_v26, %v4083_v28  ;;  %v2538_v28 = vld [vmem:[%s3957_s5] ss:$0 sm:$0xff]  ;;  %s2862_s5 = smov [#allocation12]  }
 0x71e   :  { %s2500_s20 = sshll.u32 %s2862_s5, 4  ;;  %s2501_s20 = int_to_ptr.vmem [resolvable:$true] %s2500_s20 }
 0x71f   :  { %2713 = vpow2.f32 %v2532_v16  ;;  %v2533_v24 = vmul.f32 -1.442695, %v2076_v20  ;;  %v2534_v21 = vmul.f32 -1.442695, %v2078_v53  ;;  %v4091_v16 = vld [vmem:[#allocation36_spill] sm:$0xff]  ;;  %s2825_s21 = scalar_lea.vmem %s2501_s20, 1024  ;;  %p2830_p7 = scmp.lt.s32.totalorder %s2501_s20, %s2501_s20 }
 0x720   :  { %p2826_p6 = scmp.ne.s32.totalorder %s2501_s20, %s2825_s21  ;;  %p2831_p8 = scmp.lt.s32.totalorder %s2825_s21, %s2825_s21 }
 0x721   :  { %2715 = vpow2.f32 %v2533_v24 }
 0x722   :  { %2717 = vtanh.f32 %v2077_v54  ;;  %p2832_p9 = por %p2831_p8, %p2830_p7 }
 0x723   :  { %2719 = vpow2.f32 %v2534_v21 }
 0x724   :  { %p2833_p10 = pnand %p2832_p9, %p2826_p6 }
 0x72c   :  { %v2714_v57 = vpop.eup %2713 }
 0x72d   :  { %v2082_v36 = vadd.f32 1.0, %v2714_v57 }
 0x72e   :  { %v2716_v0 = vpop.eup %2715 }
 0x72f   :  { %2721 = vrcp.f32 %v2082_v36  ;;  %v2088_v6 = vadd.f32 1.0, %v2716_v0  ;;  %v2718_v34 = vpop.eup %2717 }
 0x730   :  { %v2720_v58 = vpop.eup %2719 }
 0x731   :  { %2723 = vrcp.f32 %v2088_v6  ;;  %v2095_v39 = vadd.f32 1.0, %v2720_v58 }
 0x733   :  { %2725 = vrcp.f32 %v2095_v39 }
 0x73c   :  { %v2722_v12 = vpop.eup %2721 }
 0x73d   :  { %v2099_v37 = vmul.f32 %v2722_v12, %v2718_v34 }
 0x73e   :  { %v2724_v14 = vpop.eup %2723 }
 0x73f   :  { %v2098_v18 = vmul.f32 %v2724_v14, %v3875_v61  ;;  %v2370_v61 = vld [vmem:[#allocation10 + $0x58] sm:$0xff] }
 0x740   :  { %v2726_v47 = vpop.eup %2725 }
 0x741   :  { %v3929_v22 = vadd.f32 %v2099_v37, %v2098_v18 }
 0x743   :  { %2727 = vtanh.f32 %v3929_v22 }
 0x750   :  { %v2728_v2 = vpop.eup %2727 }
 0x751   :  { %v2102_v11 = vmul.f32 %v2728_v2, %v2726_v47 }
 0x753   :  { %2237 = vmatmul.mubr.f32.vlgmr.msra.gmra.mxu0 %v2102_v11  ;;  %2308 = vmatmul.mubr.f32.vlgmr.msra.gmra.mxu1 %v2102_v11  ;;  %v2357_v1 = vmax.f32 %v2102_v11, 0.0 }
 0x754   :  { %2564 = vmatpush3.msra.mxu0 %v2374_v3  ;;  %2595 = vmatprep.mubr.f32.mxu0 %v2351_v38  ;;  %v2354_v3 = vmax.f32 %v3658_v13, 0.0 }
 0x755   :  { %2565 = vmatprep.subr.mxu0 %v2373_v56 }
 0x756   :  { %2566 = vmatpush3.msra.mxu0 %v2373_v56 }
 0x757   :  { %2567 = vmatprep.subr.mxu0 %v2372_v19 }
 0x758   :  { %2568 = vmatpush3.msra.mxu0 %v2372_v19 }
 0x759   :  { %2569 = vmatprep.subr.mxu0 %v2371_v32 }
 0x75a   :  { %2570 = vmatpush3.msra.mxu0 %v2371_v32 }
 0x75b   :  { %2571 = vmatprep.subr.mxu0 %v2370_v61 }
 0x75c   :  { %2572 = vmatpush3.msra.mxu0 %v2370_v61 }
 0x75d   :  { %2573 = vmatprep.subr.mxu0 %v2369_v59 }
 0x75e   :  { %2574 = vmatpush3.msra.mxu0 %v2369_v59 }
 0x75f   :  { %2575 = vmatprep.subr.mxu0 %v2368_v15 }
 0x760   :  { %2576 = vmatpush3.msra.mxu0 %v2368_v15 }
 0x761   :  { %2577 = vmatprep.subr.mxu0 %v2367_v42 }
 0x762   :  { %2578 = vmatpush3.msra.mxu0 %v2367_v42 }
 0x763   :  { %2579 = vmatprep.subr.mxu0 %v2366_v46 }
 0x764   :  { %2580 = vmatpush3.msra.mxu0 %v2366_v46 }
 0x765   :  { %2581 = vmatprep.subr.mxu0 %v2365_v40 }
 0x766   :  { %2582 = vmatpush3.msra.mxu0 %v2365_v40 }
 0x767   :  { %2583 = vmatprep.subr.mxu0 %v2364_v52 }
 0x768   :  { %2584 = vmatpush3.msra.mxu0 %v2364_v52 }
 0x769   :  { %2585 = vmatprep.subr.mxu0 %v2363_v33 }
 0x76a   :  { %2586 = vmatpush3.msra.mxu0 %v2363_v33 }
 0x76b   :  { %2587 = vmatprep.subr.mxu0 %v2362_v5 }
 0x76c   :  { %2588 = vmatpush3.msra.mxu0 %v2362_v5 }
 0x76d   :  { %2589 = vmatprep.subr.mxu0 %v2361_v63 }
 0x76e   :  { %2590 = vmatpush3.msra.mxu0 %v2361_v63 }
 0x76f   :  { %2591 = vmatprep.subr.mxu0 %v2360_v8 }
 0x770   :  { %2592 = vmatpush3.msra.mxu0 %v2360_v8 }
 0x771   :  { %2593 = vmatprep.subr.mxu0 %v2359_v60 }
 0x772   :  { %2594 = vmatpush3.msra.mxu0 %v2359_v60 }
 0x773   :  { %2596 = vmatmul.mubr.f32.vlgmr.msra.gmra.mxu0 %v2352_v43 }
 0x774   :  { %2598 = vmatprep.mubr.f32.mxu0 %v2353_v25 }
 0x777   :  { %2599 = vmatmul.mubr.f32.gmra.mxu0 %v2354_v3 }
 0x778   :  { %2601 = vmatprep.mubr.f32.mxu0 %v2355_v27 }
 0x77b   :  { %2602 = vmatmul.mubr.f32.gmra.mxu0 %v2356_v29 }
 0x77c   :  { %2604 = vmatprep.mubr.f32.mxu0 %v2357_v1 }
 0x813   :  { %v2238_v7 = vpop.f32.mrf.mxu0  ;;  %v2309_v9 = vpop.f32.mrf.mxu1 }
 0x814   :  { %v2314_v48 = vadd.f32 %v2238_v7, %v4088_v31  ;;  %v2316_v41 = vadd.f32 %v2309_v9, %v4091_v16 }
 0x815   :  { %v2240_v10 = vpop.f32.mrf.mxu0  ;;  %v2311_v13 = vpop.f32.mrf.mxu1 }
 0x816   :  { %v2535_v4 = vmul.f32 -1.442695, %v2314_v48  ;;  %v2315_v17 = vadd.f32 %v2240_v10, %v4089_v44  ;;  %v2317_v62 = vadd.f32 %v2311_v13, %v4090_v51 }
 0x818   :  { %2729 = vpow2.f32 %v2535_v4  ;;  %v2536_v35 = vmul.f32 -1.442695, %v2315_v17  ;;  %v2537_v55 = vmul.f32 -1.442695, %v2317_v62 }
 0x81a   :  { %2731 = vpow2.f32 %v2536_v35 }
 0x81b   :  { %2733 = vtanh.f32 %v2316_v41 }
 0x81c   :  { %2735 = vpow2.f32 %v2537_v55 }
 0x825   :  { %v2730_v20 = vpop.eup %2729 }
 0x826   :  { %v2321_v45 = vadd.f32 1.0, %v2730_v20 }
 0x827   :  { %v2732_v24 = vpop.eup %2731 }
 0x828   :  { %2737 = vrcp.f32 %v2321_v45  ;;  %v2327_v26 = vadd.f32 1.0, %v2732_v24  ;;  %v2734_v53 = vpop.eup %2733 }
 0x829   :  { %v2736_v54 = vpop.eup %2735 }
 0x82a   :  { %2739 = vrcp.f32 %v2327_v26  ;;  %v2334_v58 = vadd.f32 1.0, %v2736_v54 }
 0x82c   :  { %2741 = vrcp.f32 %v2334_v58 }
 0x833   :  { %v2597_v30 = vpop.f32.mrf.mxu0 }
 0x834   :  { %v2454_v21 = vadd.f32 %v2597_v30, %v2538_v28 }
 0x835   :  { %v2738_v57 = vpop.eup %2737  ;;  %v2448_v36 = vpop.f32.mrf.mxu0 }
 0x836   :  { %v2338_v0 = vmul.f32 %v2738_v57, %v2734_v53  ;;  %2488 = vst [vmem:[#allocation12 + $0x8] sm:$0xff] %v2454_v21  ;;  %v2449_v6 = vadd.f32 %v2538_v28, %v2448_v36 }
 0x837   :  { %v2740_v34 = vpop.eup %2739  ;;  %v2600_v12 = vpop.f32.mrf.mxu0 }
 0x838   :  { %v2337_v37 = vmul.f32 %v2740_v34, %v3929_v22  ;;  %2487 = vst [vmem:[#allocation12] sm:$0xff] %v2449_v6  ;;  %v2464_v14 = vadd.f32 %v2600_v12, %v2538_v28 }
 0x839   :  { %v2458_v39 = vpop.f32.mrf.mxu0  ;;  %v2742_v38 = vpop.eup %2741 }
 0x83a   :  { %2490 = vst [vmem:[#allocation12 + $0x18] sm:$0xff] %v2464_v14  ;;  %v2459_v18 = vadd.f32 %v2538_v28, %v2458_v39  ;;  %v2339_v47 = vadd.f32 %v2338_v0, %v2337_v37 }
 0x83b   :  { %v2603_v2 = vpop.f32.mrf.mxu0 }
 0x83c   :  { %2489 = vst [vmem:[#allocation12 + $0x10] sm:$0xff] %v2459_v18  ;;  %v2474_v11 = vadd.f32 %v2603_v2, %v2538_v28  ;;  %2743 = vtanh.f32 %v2339_v47 }
 0x83d   :  { %v2468_v56 = vpop.f32.mrf.mxu0 }
 0x83e   :  { %2492 = vst [vmem:[#allocation12 + $0x28] sm:$0xff] %v2474_v11  ;;  %v2469_v50 = vadd.f32 %v2538_v28, %v2468_v56 }
 0x840   :  { %2491 = vst [vmem:[#allocation12 + $0x20] sm:$0xff] %v2469_v50 }
 0x849   :  { %v2744_v19 = vpop.eup %2743 }
 0x84a   :  { %v2341_v32 = vmul.f32 %v2744_v19, %v2742_v38 }
 0x84c   :  { %v2358_v61 = vmax.f32 %v2341_v32, 0.0 }
 0x84e   :  { %2605 = vmatmul.mubr.f32.gmra.mxu0 %v2358_v61 }
 0x90e   :  { %v2606_v22 = vpop.f32.mrf.mxu0 }
 0x90f   :  { %v2484_v59 = vadd.f32 %v2606_v22, %v2538_v28 }
 0x910   :  { %v2478_v15 = vpop.f32.mrf.mxu0 }
 0x911   :  { %2494 = vst [vmem:[#allocation12 + $0x38] sm:$0xff] %v2484_v59  ;;  %v2479_v42 = vadd.f32 %v2538_v28, %v2478_v15 }
 0x913   :  { %2493 = vst [vmem:[#allocation12 + $0x30] sm:$0xff] %v2479_v42 }
 0x914   :  { %2836 = shalt.err (!%p2833_p10)
}
 0x915   :  { %2506 = dma.vmem_to_hbm [thread:$0]  %s2501_s20, 1024, %s3958_s6, [#allocation6], %s2857_s7, %s2857_s7, %s2858_s8  }
 0x916   :  { %2851 = dma.done.wait [#allocation6], 1024  }
 0x917   :  { %2852 = vsyncadd [#allocation6], 4294966272 }
 0x918   :  { %2510 = vsyncpa [#allocation5], 1 }
 0x919   :  { %2511 = vsyncpa [#allocation8], 1 }
 0x91a   :  { %2512 = vsyncpa [#allocation11], 1 }
 0x91b   :  { %2513 = vsyncpa [#allocation6], 1 }

</bundles_post_ra>
